<compile_context>
chip_gen: v5e
topology: v5e:2x2
jax: 0.10.0
libtpu: 0.0.40
codegen_flags: <defaults>
</compile_context>

<pallas_src>
import math
import functools

import jax
import jax.numpy as jnp
from jax import lax
from jax.experimental import pallas as pl
from jax.experimental.pallas import tpu as pltpu

_LANE = 128
_SUBLANE = 8
_UNIT = _LANE * _SUBLANE  # 1024 edges == one full (8,128) f32 vreg footprint


def _round_up(a: int, m: int) -> int:
    return (a + m - 1) // m * m


def _int_pow(x, n: int):
    """x**n for integer n >= 1 via a multiply chain (pure VPU, no exp/log)."""
    assert n >= 1
    result = None
    base = x
    while n:
        if n & 1:
            result = base if result is None else result * base
        n >>= 1
        if n:
            base = base * base
    return result


def _rbf_edge_kernel(w_ref, vec_ref, out_ref, *, r_max: float, p: float,
                     num_basis: int, canonical_sin: bool):
    """Fused edge-length norm + Bessel basis + polynomial cutoff.

    w_ref:   (NB, 128)      row k holds w_k broadcast across all 128 lanes
    vec_ref: (3, TR, 128)   x/y/z component rows; 128 edges per lane row
    out_ref: (NB, TR, 128)  edge embedding tile (basis-major, lane-dense)
    """
    # Per-row loads -> full (TR,128) vregs; 3 VPU multiply-adds, no XLU reduce.
    x0 = vec_ref[0]
    x1 = vec_ref[1]
    x2 = vec_ref[2]
    r2 = x0 * x0 + x1 * x1 + x2 * x2                       # (TR, 128)

    inv_r = lax.rsqrt(r2)
    # One Newton-Raphson refinement step: keeps 1/r at full f32 precision even
    # if the hardware rsqrt is approximate (3 cheap VPU ops).
    inv_r = inv_r * (1.5 - 0.5 * r2 * inv_r * inv_r)
    r = r2 * inv_r                                         # == sqrt(r2)

    inv_rmax = 1.0 / r_max
    x = r * inv_rmax                                       # r / r_max

    # Polynomial cutoff: 1 - c0*x^p + c1*x^(p+1) - c2*x^(p+2)   (Horner form)
    c0 = (p + 1.0) * (p + 2.0) / 2.0
    c1 = p * (p + 2.0)
    c2 = p * (p + 1.0) / 2.0
    p_int = int(p)
    if float(p_int) == p and p_int >= 1:
        xp = _int_pow(x, p_int)          # integer power: multiply chain only
    else:
        xp = x ** p                      # non-integral p: transcendental fallback
    env = 1.0 + xp * (-c0 + x * (c1 - c2 * x))
    env = env * (x < 1.0).astype(jnp.float32)

    # Fold all per-edge scalar factors into a single multiplier.
    scale = (2.0 * inv_rmax) * inv_r * env                 # (TR, 128)

    if canonical_sin:
        # Only valid for w_k = k*pi (untrained weights): one sin + one cos,
        # then Chebyshev recurrence sin((k+1)t) = 2 cos(t) sin(kt) - sin((k-1)t).
        theta = jnp.float32(math.pi) * x
        s_prev = jnp.zeros_like(x)
        s_cur = jnp.sin(theta)
        two_cos = 2.0 * jnp.cos(theta)
        for k in range(num_basis):
            out_ref[k] = (s_cur * scale).astype(out_ref.dtype)
            s_prev, s_cur = s_cur, two_cos * s_cur - s_prev
    else:
        for k in range(num_basis):
            wk = w_ref[k]                                  # (128,), all lanes = w_k
            out_ref[k] = (jnp.sin(wk * x) * scale).astype(out_ref.dtype)


def radial_basis_edge_encoding(edge_vectors: jax.Array,
                               bessel_weights: jax.Array,
                               *,
                               r_max: float = 4.0,
                               polynomial_p: float = 6.0,
                               tile_edges: int = 16384,
                               out_dtype=jnp.float32,
                               lane_major_output: bool = False,
                               use_canonical_sin_recurrence: bool = False
                               ) -> jax.Array:
    """Pallas wrapper.

    edge_vectors: [E, 3] float; bessel_weights: [num_basis] float.
    Returns [E, num_basis] (module layout) or [num_basis, E] lane-dense if
    `lane_major_output=True` (lets a fused consumer skip the transpose).
    Pass out_dtype=jnp.bfloat16 only when the consumer tolerates it.
    `use_canonical_sin_recurrence` is valid ONLY while bessel_weights == k*pi.
    """
    E, D = edge_vectors.shape
    assert D == 3
    num_basis = int(bessel_weights.shape[0])

    # --- tile selection: multiples of 1024 edges (8 sublane rows of 128) ---
    e_unit = max(_round_up(E, _UNIT), _UNIT)
    te = min(_round_up(int(tile_edges), _UNIT), e_unit)
    # v7x megacore: keep >= 2 grid steps when there is enough work so the
    # ("parallel",) grid axis can shard across both TensorCores.
    if (e_unit // te) < 2 and e_unit >= 2 * _UNIT:
        te = _round_up(e_unit // 2, _UNIT)
    e_pad = _round_up(e_unit, te)
    rows = e_pad // _LANE
    tile_rows = te // _LANE

    # --- inputs: one pad on the transposed view + free reshape (lane-dense) ---
    vecs_t = edge_vectors.astype(jnp.float32).T                    # (3, E)
    vecs_t = jnp.pad(vecs_t, ((0, 0), (0, e_pad - E)),
                     constant_values=1.0)                          # finite pad lanes
    vecs_3d = vecs_t.reshape(3, rows, _LANE)

    # Weights broadcast across all 128 lanes -> aligned full-width load,
    # constant block index (DMA'd once, reused every grid step).
    w_lanes = jnp.broadcast_to(
        bessel_weights.astype(jnp.float32).reshape(num_basis, 1),
        (num_basis, _LANE))

    kernel = functools.partial(
        _rbf_edge_kernel, r_max=float(r_max), p=float(polynomial_p),
        num_basis=num_basis,
        canonical_sin=bool(use_canonical_sin_recurrence))

    # Double-buffered input + output blocks; only raise the scoped-VMEM limit
    # when a caller picks a very large tile.
    vmem_bytes = 2 * (3 + num_basis) * te * 4
    vmem_limit = None
    if vmem_bytes > 16 * 1024 * 1024:
        vmem_limit = min(2 * vmem_bytes, 100 * 1024 * 1024)

    grid = (e_pad // te,)
    out_3d = pl.pallas_call(
        kernel,
        out_shape=jax.ShapeDtypeStruct((num_basis, rows, _LANE), out_dtype),
        grid_spec=pltpu.PrefetchScalarGridSpec(
            num_scalar_prefetch=0,
            grid=grid,
            in_specs=[
                # weights: full (NB, 128) block, same every step
                pl.BlockSpec((num_basis, _LANE), lambda i: (0, 0)),
                # edge vectors: full xyz rows, tile over the edge-row axis
                pl.BlockSpec((3, tile_rows, _LANE), lambda i: (0, i, 0)),
            ],
            out_specs=pl.BlockSpec((num_basis, tile_rows, _LANE),
                                   lambda i: (0, i, 0)),
        ),
        compiler_params=pltpu.CompilerParams(
            dimension_semantics=("parallel",),
            vmem_limit_bytes=vmem_limit),
    )(w_lanes, vecs_3d)

    out_flat = out_3d.reshape(num_basis, e_pad)          # (NB, e_pad) lane-dense
    if lane_major_output:
        return out_flat[:, :E]                           # consumer fuses layout
    # Module layout [E, num_basis]; slice BEFORE transposing to minimize the
    # epilogue copy.
    return out_flat[:, :E].T


def _reference(edge_vectors, bessel_weights, r_max=4.0, p=6.0):
    """Pure-JAX reference matching the PyTorch module."""
    r = jnp.linalg.norm(edge_vectors, axis=-1)                   # [E]
    prefactor = 2.0 / r_max
    numerator = jnp.sin(bessel_weights[None, :] * r[:, None] / r_max)
    basis = prefactor * numerator / r[:, None]
    x = r / r_max
    env = (1.0
           - (p + 1.0) * (p + 2.0) / 2.0 * jnp.power(x, p)
           + p * (p + 2.0) * jnp.power(x, p + 1.0)
           - p * (p + 1.0) / 2.0 * jnp.power(x, p + 2.0))
    env = env * (x < 1.0).astype(x.dtype)
    return basis * env[:, None]


if __name__ == "__main__":
    r_max = 4.0
    num_basis = 8
    polynomial_p = 6.0
    num_edges = 200   # deliberately not a multiple of 128 to exercise padding

    # Deterministic parameter init (matches BesselBasis.__init__):
    # bessel_weights = linspace(1, num_basis, num_basis) * pi
    bessel_weights = jnp.linspace(1.0, float(num_basis), num_basis,
                                  dtype=jnp.float32) * math.pi

    # Deterministic example edge vectors; scale so most lengths fall in (0, r_max)
    key = jax.random.PRNGKey(0)
    edge_vectors = jax.random.normal(key, (num_edges, 3), dtype=jnp.float32) * 1.5

    out = radial_basis_edge_encoding(edge_vectors, bessel_weights,
                                     r_max=r_max, polynomial_p=polynomial_p)
    out = jax.block_until_ready(out)

    ref = _reference(edge_vectors, bessel_weights, r_max=r_max, p=polynomial_p)
    assert out.shape == (num_edges, num_basis)
    assert jnp.allclose(out, ref, atol=1e-5, rtol=1e-5), "mismatch vs reference"

    print("KERNEL_OK")
</pallas_src>

<mosaic_0001>
module attributes {stable_mosaic.version = 11 : i64} {
  func.func @_rbf_edge_kernel(%arg0: i32, %arg1: memref<8x128xf32, #tpu.memory_space<vmem>>, %arg2: memref<3x8x128xf32, #tpu.memory_space<vmem>>, %arg3: memref<8x8x128xf32, #tpu.memory_space<vmem>>) attributes {dimension_semantics = [#tpu.dimension_semantics<parallel>], iteration_bounds = array<i64: 1>, scalar_prefetch = 0 : i64, scratch_operands = 0 : i64, tpu.core_type = #tpu.core_type<tc>, window_params = [{pipeline_mode = #tpu.pipeline_mode<synchronous>, transform_indices = @transform_0, window_bounds = array<i64: 8, 128>}, {transform_indices = @transform_1, window_bounds = array<i64: 3, 8, 128>}, {transform_indices = @transform_2, window_bounds = array<i64: 8, 8, 128>}]} {
    %c0 = arith.constant 0 : index
    %c0_0 = arith.constant 0 : index
    %c0_1 = arith.constant 0 : index
    %0 = vector.load %arg2[%c0, %c0_0, %c0_1] : memref<3x8x128xf32, #tpu.memory_space<vmem>>, vector<1x8x128xf32>
    %1 = vector.shape_cast %0 : vector<1x8x128xf32> to vector<8x128xf32>
    %c1 = arith.constant 1 : index
    %c0_2 = arith.constant 0 : index
    %c0_3 = arith.constant 0 : index
    %2 = vector.load %arg2[%c1, %c0_2, %c0_3] : memref<3x8x128xf32, #tpu.memory_space<vmem>>, vector<1x8x128xf32>
    %3 = vector.shape_cast %2 : vector<1x8x128xf32> to vector<8x128xf32>
    %c2 = arith.constant 2 : index
    %c0_4 = arith.constant 0 : index
    %c0_5 = arith.constant 0 : index
    %4 = vector.load %arg2[%c2, %c0_4, %c0_5] : memref<3x8x128xf32, #tpu.memory_space<vmem>>, vector<1x8x128xf32>
    %5 = vector.shape_cast %4 : vector<1x8x128xf32> to vector<8x128xf32>
    %6 = arith.mulf %1, %1 : vector<8x128xf32>
    %7 = arith.mulf %3, %3 : vector<8x128xf32>
    %8 = arith.addf %6, %7 : vector<8x128xf32>
    %9 = arith.mulf %5, %5 : vector<8x128xf32>
    %10 = arith.addf %8, %9 : vector<8x128xf32>
    %11 = math.rsqrt %10 : vector<8x128xf32>
    %cst = arith.constant 5.000000e-01 : f32
    %12 = vector.broadcast %cst : f32 to vector<8x128xf32>
    %13 = arith.mulf %12, %10 : vector<8x128xf32>
    %14 = arith.mulf %13, %11 : vector<8x128xf32>
    %15 = arith.mulf %14, %11 : vector<8x128xf32>
    %cst_6 = arith.constant 1.500000e+00 : f32
    %16 = vector.broadcast %cst_6 : f32 to vector<8x128xf32>
    %17 = arith.subf %16, %15 : vector<8x128xf32>
    %18 = arith.mulf %11, %17 : vector<8x128xf32>
    %19 = arith.mulf %10, %18 : vector<8x128xf32>
    %cst_7 = arith.constant 2.500000e-01 : f32
    %20 = vector.broadcast %cst_7 : f32 to vector<8x128xf32>
    %21 = arith.mulf %19, %20 : vector<8x128xf32>
    %22 = arith.mulf %21, %21 : vector<8x128xf32>
    %23 = arith.mulf %22, %22 : vector<8x128xf32>
    %24 = arith.mulf %22, %23 : vector<8x128xf32>
    %cst_8 = arith.constant 2.100000e+01 : f32
    %25 = vector.broadcast %cst_8 : f32 to vector<8x128xf32>
    %26 = arith.mulf %25, %21 : vector<8x128xf32>
    %cst_9 = arith.constant 4.800000e+01 : f32
    %27 = vector.broadcast %cst_9 : f32 to vector<8x128xf32>
    %28 = arith.subf %27, %26 : vector<8x128xf32>
    %29 = arith.mulf %21, %28 : vector<8x128xf32>
    %cst_10 = arith.constant -2.800000e+01 : f32
    %30 = vector.broadcast %cst_10 : f32 to vector<8x128xf32>
    %31 = arith.addf %30, %29 : vector<8x128xf32>
    %32 = arith.mulf %24, %31 : vector<8x128xf32>
    %cst_11 = arith.constant 1.000000e+00 : f32
    %33 = vector.broadcast %cst_11 : f32 to vector<8x128xf32>
    %34 = arith.addf %33, %32 : vector<8x128xf32>
    %cst_12 = arith.constant 1.000000e+00 : f32
    %35 = vector.broadcast %cst_12 : f32 to vector<8x128xf32>
    %36 = arith.cmpf olt, %21, %35 : vector<8x128xf32>
    %37 = arith.extui %36 : vector<8x128xi1> to vector<8x128xi32>
    %38 = arith.sitofp %37 : vector<8x128xi32> to vector<8x128xf32>
    %39 = arith.mulf %34, %38 : vector<8x128xf32>
    %cst_13 = arith.constant 5.000000e-01 : f32
    %40 = vector.broadcast %cst_13 : f32 to vector<8x128xf32>
    %41 = arith.mulf %40, %18 : vector<8x128xf32>
    %42 = arith.mulf %41, %39 : vector<8x128xf32>
    %c0_14 = arith.constant 0 : index
    %c0_15 = arith.constant 0 : index
    %43 = vector.load %arg1[%c0_14, %c0_15] : memref<8x128xf32, #tpu.memory_space<vmem>>, vector<1x128xf32>
    %44 = vector.shape_cast %43 : vector<1x128xf32> to vector<128xf32>
    %45 = vector.shape_cast %44 : vector<128xf32> to vector<1x128xf32>
    %46 = vector.broadcast %45 : vector<1x128xf32> to vector<8x128xf32>
    %47 = arith.mulf %46, %21 : vector<8x128xf32>
    %48 = math.sin %47 : vector<8x128xf32>
    %49 = arith.mulf %48, %42 : vector<8x128xf32>
    %c0_16 = arith.constant 0 : index
    %c0_17 = arith.constant 0 : index
    %c0_18 = arith.constant 0 : index
    %50 = vector.load %arg3[%c0_16, %c0_17, %c0_18] : memref<8x8x128xf32, #tpu.memory_space<vmem>>, vector<1x8x128xf32>
    %51 = vector.shape_cast %50 : vector<1x8x128xf32> to vector<8x128xf32>
    %52 = vector.shape_cast %49 : vector<8x128xf32> to vector<1x8x128xf32>
    tpu.vector_store %arg3[%c0_16, %c0_17, %c0_18], %52 {strides = array<i32>} : memref<8x8x128xf32, #tpu.memory_space<vmem>>, vector<1x8x128xf32>,
    %c1_19 = arith.constant 1 : index
    %c0_20 = arith.constant 0 : index
    %53 = vector.load %arg1[%c1_19, %c0_20] : memref<8x128xf32, #tpu.memory_space<vmem>>, vector<1x128xf32>
    %54 = vector.shape_cast %53 : vector<1x128xf32> to vector<128xf32>
    %55 = vector.shape_cast %54 : vector<128xf32> to vector<1x128xf32>
    %56 = vector.broadcast %55 : vector<1x128xf32> to vector<8x128xf32>
    %57 = arith.mulf %56, %21 : vector<8x128xf32>
    %58 = math.sin %57 : vector<8x128xf32>
    %59 = arith.mulf %58, %42 : vector<8x128xf32>
    %c1_21 = arith.constant 1 : index
    %c0_22 = arith.constant 0 : index
    %c0_23 = arith.constant 0 : index
    %60 = vector.load %arg3[%c1_21, %c0_22, %c0_23] : memref<8x8x128xf32, #tpu.memory_space<vmem>>, vector<1x8x128xf32>
    %61 = vector.shape_cast %60 : vector<1x8x128xf32> to vector<8x128xf32>
    %62 = vector.shape_cast %59 : vector<8x128xf32> to vector<1x8x128xf32>
    tpu.vector_store %arg3[%c1_21, %c0_22, %c0_23], %62 {strides = array<i32>} : memref<8x8x128xf32, #tpu.memory_space<vmem>>, vector<1x8x128xf32>,
    %c2_24 = arith.constant 2 : index
    %c0_25 = arith.constant 0 : index
    %63 = vector.load %arg1[%c2_24, %c0_25] : memref<8x128xf32, #tpu.memory_space<vmem>>, vector<1x128xf32>
    %64 = vector.shape_cast %63 : vector<1x128xf32> to vector<128xf32>
    %65 = vector.shape_cast %64 : vector<128xf32> to vector<1x128xf32>
    %66 = vector.broadcast %65 : vector<1x128xf32> to vector<8x128xf32>
    %67 = arith.mulf %66, %21 : vector<8x128xf32>
    %68 = math.sin %67 : vector<8x128xf32>
    %69 = arith.mulf %68, %42 : vector<8x128xf32>
    %c2_26 = arith.constant 2 : index
    %c0_27 = arith.constant 0 : index
    %c0_28 = arith.constant 0 : index
    %70 = vector.load %arg3[%c2_26, %c0_27, %c0_28] : memref<8x8x128xf32, #tpu.memory_space<vmem>>, vector<1x8x128xf32>
    %71 = vector.shape_cast %70 : vector<1x8x128xf32> to vector<8x128xf32>
    %72 = vector.shape_cast %69 : vector<8x128xf32> to vector<1x8x128xf32>
    tpu.vector_store %arg3[%c2_26, %c0_27, %c0_28], %72 {strides = array<i32>} : memref<8x8x128xf32, #tpu.memory_space<vmem>>, vector<1x8x128xf32>,
    %c3 = arith.constant 3 : index
    %c0_29 = arith.constant 0 : index
    %73 = vector.load %arg1[%c3, %c0_29] : memref<8x128xf32, #tpu.memory_space<vmem>>, vector<1x128xf32>
    %74 = vector.shape_cast %73 : vector<1x128xf32> to vector<128xf32>
    %75 = vector.shape_cast %74 : vector<128xf32> to vector<1x128xf32>
    %76 = vector.broadcast %75 : vector<1x128xf32> to vector<8x128xf32>
    %77 = arith.mulf %76, %21 : vector<8x128xf32>
    %78 = math.sin %77 : vector<8x128xf32>
    %79 = arith.mulf %78, %42 : vector<8x128xf32>
    %c3_30 = arith.constant 3 : index
    %c0_31 = arith.constant 0 : index
    %c0_32 = arith.constant 0 : index
    %80 = vector.load %arg3[%c3_30, %c0_31, %c0_32] : memref<8x8x128xf32, #tpu.memory_space<vmem>>, vector<1x8x128xf32>
    %81 = vector.shape_cast %80 : vector<1x8x128xf32> to vector<8x128xf32>
    %82 = vector.shape_cast %79 : vector<8x128xf32> to vector<1x8x128xf32>
    tpu.vector_store %arg3[%c3_30, %c0_31, %c0_32], %82 {strides = array<i32>} : memref<8x8x128xf32, #tpu.memory_space<vmem>>, vector<1x8x128xf32>,
    %c4 = arith.constant 4 : index
    %c0_33 = arith.constant 0 : index
    %83 = vector.load %arg1[%c4, %c0_33] : memref<8x128xf32, #tpu.memory_space<vmem>>, vector<1x128xf32>
    %84 = vector.shape_cast %83 : vector<1x128xf32> to vector<128xf32>
    %85 = vector.shape_cast %84 : vector<128xf32> to vector<1x128xf32>
    %86 = vector.broadcast %85 : vector<1x128xf32> to vector<8x128xf32>
    %87 = arith.mulf %86, %21 : vector<8x128xf32>
    %88 = math.sin %87 : vector<8x128xf32>
    %89 = arith.mulf %88, %42 : vector<8x128xf32>
    %c4_34 = arith.constant 4 : index
    %c0_35 = arith.constant 0 : index
    %c0_36 = arith.constant 0 : index
    %90 = vector.load %arg3[%c4_34, %c0_35, %c0_36] : memref<8x8x128xf32, #tpu.memory_space<vmem>>, vector<1x8x128xf32>
    %91 = vector.shape_cast %90 : vector<1x8x128xf32> to vector<8x128xf32>
    %92 = vector.shape_cast %89 : vector<8x128xf32> to vector<1x8x128xf32>
    tpu.vector_store %arg3[%c4_34, %c0_35, %c0_36], %92 {strides = array<i32>} : memref<8x8x128xf32, #tpu.memory_space<vmem>>, vector<1x8x128xf32>,
    %c5 = arith.constant 5 : index
    %c0_37 = arith.constant 0 : index
    %93 = vector.load %arg1[%c5, %c0_37] : memref<8x128xf32, #tpu.memory_space<vmem>>, vector<1x128xf32>
    %94 = vector.shape_cast %93 : vector<1x128xf32> to vector<128xf32>
    %95 = vector.shape_cast %94 : vector<128xf32> to vector<1x128xf32>
    %96 = vector.broadcast %95 : vector<1x128xf32> to vector<8x128xf32>
    %97 = arith.mulf %96, %21 : vector<8x128xf32>
    %98 = math.sin %97 : vector<8x128xf32>
    %99 = arith.mulf %98, %42 : vector<8x128xf32>
    %c5_38 = arith.constant 5 : index
    %c0_39 = arith.constant 0 : index
    %c0_40 = arith.constant 0 : index
    %100 = vector.load %arg3[%c5_38, %c0_39, %c0_40] : memref<8x8x128xf32, #tpu.memory_space<vmem>>, vector<1x8x128xf32>
    %101 = vector.shape_cast %100 : vector<1x8x128xf32> to vector<8x128xf32>
    %102 = vector.shape_cast %99 : vector<8x128xf32> to vector<1x8x128xf32>
    tpu.vector_store %arg3[%c5_38, %c0_39, %c0_40], %102 {strides = array<i32>} : memref<8x8x128xf32, #tpu.memory_space<vmem>>, vector<1x8x128xf32>,
    %c6 = arith.constant 6 : index
    %c0_41 = arith.constant 0 : index
    %103 = vector.load %arg1[%c6, %c0_41] : memref<8x128xf32, #tpu.memory_space<vmem>>, vector<1x128xf32>
    %104 = vector.shape_cast %103 : vector<1x128xf32> to vector<128xf32>
    %105 = vector.shape_cast %104 : vector<128xf32> to vector<1x128xf32>
    %106 = vector.broadcast %105 : vector<1x128xf32> to vector<8x128xf32>
    %107 = arith.mulf %106, %21 : vector<8x128xf32>
    %108 = math.sin %107 : vector<8x128xf32>
    %109 = arith.mulf %108, %42 : vector<8x128xf32>
    %c6_42 = arith.constant 6 : index
    %c0_43 = arith.constant 0 : index
    %c0_44 = arith.constant 0 : index
    %110 = vector.load %arg3[%c6_42, %c0_43, %c0_44] : memref<8x8x128xf32, #tpu.memory_space<vmem>>, vector<1x8x128xf32>
    %111 = vector.shape_cast %110 : vector<1x8x128xf32> to vector<8x128xf32>
    %112 = vector.shape_cast %109 : vector<8x128xf32> to vector<1x8x128xf32>
    tpu.vector_store %arg3[%c6_42, %c0_43, %c0_44], %112 {strides = array<i32>} : memref<8x8x128xf32, #tpu.memory_space<vmem>>, vector<1x8x128xf32>,
    %c7 = arith.constant 7 : index
    %c0_45 = arith.constant 0 : index
    %113 = vector.load %arg1[%c7, %c0_45] : memref<8x128xf32, #tpu.memory_space<vmem>>, vector<1x128xf32>
    %114 = vector.shape_cast %113 : vector<1x128xf32> to vector<128xf32>
    %115 = vector.shape_cast %114 : vector<128xf32> to vector<1x128xf32>
    %116 = vector.broadcast %115 : vector<1x128xf32> to vector<8x128xf32>
    %117 = arith.mulf %116, %21 : vector<8x128xf32>
    %118 = math.sin %117 : vector<8x128xf32>
    %119 = arith.mulf %118, %42 : vector<8x128xf32>
    %c7_46 = arith.constant 7 : index
    %c0_47 = arith.constant 0 : index
    %c0_48 = arith.constant 0 : index
    %120 = vector.load %arg3[%c7_46, %c0_47, %c0_48] : memref<8x8x128xf32, #tpu.memory_space<vmem>>, vector<1x8x128xf32>
    %121 = vector.shape_cast %120 : vector<1x8x128xf32> to vector<8x128xf32>
    %122 = vector.shape_cast %119 : vector<8x128xf32> to vector<1x8x128xf32>
    tpu.vector_store %arg3[%c7_46, %c0_47, %c0_48], %122 {strides = array<i32>} : memref<8x8x128xf32, #tpu.memory_space<vmem>>, vector<1x8x128xf32>,
    return
  }
  func.func @transform_0(%arg0: i32) -> (i32, i32) {
    %c0_i32 = arith.constant 0 : i32
    %c0_i32_0 = arith.constant 0 : i32
    %c0_i32_1 = arith.constant 0 : i32
    return %c0_i32, %c0_i32_0 : i32, i32
  }
  func.func @transform_1(%arg0: i32) -> (i32, i32, i32) {
    %c0_i32 = arith.constant 0 : i32
    %c0_i32_0 = arith.constant 0 : i32
    %c0_i32_1 = arith.constant 0 : i32
    return %c0_i32, %arg0, %c0_i32_0 : i32, i32, i32
  }
  func.func @transform_2(%arg0: i32) -> (i32, i32, i32) {
    %c0_i32 = arith.constant 0 : i32
    %c0_i32_0 = arith.constant 0 : i32
    %c0_i32_1 = arith.constant 0 : i32
    return %c0_i32, %arg0, %c0_i32_0 : i32, i32, i32
  }
}

</mosaic_0001>

<bundles_post_ra>
// kernel: tpu_custom_call.1
= control target key start
LH: loop header
LB: loop body
LE: loop exit
PB: predicated region body
PF: predicated region fallthrough
CT: control target
= control target key end

     0   :  { %7 = vsyncpa [#allocation3], 0  ;;  %s2470_s0 = inlined_call_operand.hbm [shape: f32[8,128], index: 0, kind: input, shape index: {}]   ;;  %s2471_s1 = inlined_call_operand.hbm [shape: f32[3,8,128], index: 1, kind: input, shape index: {}]   ;;  %s2472_s2 = inlined_call_operand.hbm [shape: f32[8,8,128], index: 2, kind: output, shape index: {}]  }
   0x1   :  { %8 = vsyncpa [#allocation6], 0 }
   0x2   :  { %9 = vsyncpa [#allocation4], 0  ;;  %s15_s11 = sshll.u32 %s2470_s0, 4  ;;  %s1517_s12 = smov [#allocation2]   ;;  %s16_s11 = int_to_ptr.hbm [resolvable:$true] %s15_s11 }
   0x3   :  { %s17_s13 = sshll.u32 %s1517_s12, 4  ;;  %s25_s16 = sshll.u32 %s2471_s1, 4  ;;  %s18_s13 = int_to_ptr.vmem [resolvable:$true] %s17_s13  ;;  %s26_s16 = int_to_ptr.hbm [resolvable:$true] %s25_s16 }
   0x4   :  { %20 = dma.hbm_to_vmem [thread:$0]  %s16_s11, 128, %s18_s13, [#allocation3]  }
   0x5   :  { %s1518_s17 = smov [#allocation5]   ;;  %s1519_s19 = smov 128  }
   0x6   :  { %s27_s18 = sshll.u32 %s1518_s17, 4  ;;  %s1520_s20 = smov 8   ;;  %s28_s18 = int_to_ptr.vmem [resolvable:$true] %s27_s18 }
   0x7   :  { %33 = dma.hbm_to_vmem [thread:$0]  %s26_s16, 384, %s28_s18, [#allocation6], %s1519_s19, %s1519_s19, %s1520_s20  }
   0x8   :  { %1511 = dma.done.wait [#allocation3], 128  }
   0x9   :  { %1512 = vsyncadd [#allocation3], 4294967168 }
   0xa   :  { %1513 = dma.done.wait [#allocation6], 384  }
   0xb   :  { %1514 = vsyncadd [#allocation6], 4294966912  ;;  %v42_v0 = vld [vmem:[#allocation5] sm:$0xff]  ;;  %v44_v1 = vld [vmem:[#allocation5 + $0x8] sm:$0xff]  ;;  %v1521_v58 = vmov 683565275  }
   0xc   :  { %v46_v2 = vld [vmem:[#allocation5 + $0x10] sm:$0xff]  ;;  %v47_v3 = vmul.f32 %v42_v0, %v42_v0  ;;  %v48_v4 = vmul.f32 %v44_v1, %v44_v1  ;;  %v1429_v21 = vld [vmem:[#allocation2] ss:$0 sm:$0xff]  ;;  %v1430_v22 = vld [vmem:[#allocation2 + $0x1] ss:$0 sm:$0xff]  ;;  %s1529_s0 = smov [#allocation7]  }
   0xd   :  { %v50_v5 = vmul.f32 %v46_v2, %v46_v2  ;;  %v1431_v24 = vld [vmem:[#allocation2 + $0x2] ss:$0 sm:$0xff]  ;;  %v1522_v60 = vmov 2475754826   ;;  %v1523_v62 = vmov 2131351028  }
   0xe   :  { %v49_v6 = vadd.f32 %v48_v4, %v47_v3  ;;  %v1524_v0 = vmov 2102212464   ;;  %v1525_v2 = vmov 920167782   ;;  %s1375_s1 = sshll.u32 %s1529_s0, 4  ;;  %s1377_s23 = sshll.u32 %s2472_s2, 4  ;;  %s1376_s1 = int_to_ptr.vmem [resolvable:$true] %s1375_s1  ;;  %s1378_s23 = int_to_ptr.hbm [resolvable:$true] %s1377_s23 }
  0x10   :  { %v51_v7 = vadd.f32 %v50_v5, %v49_v6 }
  0x12   :  { %1437 = vrsqrt.f32 %v51_v7  ;;  %vm58_vm0 = vweird.f32 %v51_v7  ;;  %v62_v13 = vmul.f32 0.5, %v51_v7 }
  0x18   :  { %v1438_v8 = vpop.eup %1437 }
  0x19   :  { %v53_v9 = vmul.f32 %v1438_v8, %v51_v7  ;;  %vm59_vm1 = vweird.f32 %v1438_v8 }
  0x1a   :  { %vm60_vm2 = vmor %vm58_vm0, %vm59_vm1 }
  0x1b   :  { %v54_v10 = vmul.f32 %v1438_v8, %v53_v9 }
  0x1d   :  { %v55_v11 = vmul.f32 0.5, %v54_v10 }
  0x1f   :  { %v56_v12 = vsub.f32 1.5, %v55_v11  ;;  %v1526_v11 = vmov 1326507024  }
  0x21   :  { %v57_v14 = vmul.f32 %v1438_v8, %v56_v12 }
  0x23   :  { %v61_v15 = vsel %vm60_vm2, %v1438_v8, %v57_v14 }
  0x24   :  { %v63_v16 = vmul.f32 %v62_v13, %v61_v15 }
  0x26   :  { %v64_v17 = vmul.f32 %v63_v16, %v61_v15 }
  0x28   :  { %v65_v18 = vsub.f32 1.5, %v64_v17 }
  0x2a   :  { %v1554_v19 = vmul.f32 %v65_v18, %v61_v15 }
  0x2c   :  { %v67_v20 = vmul.f32 %v1554_v19, %v51_v7 }
  0x2e   :  { %v1557_v23 = vmul.f32 0.25, %v67_v20 }
  0x30   :  { %v1560_v25 = vmul.f32 %v1429_v21, %v1557_v23  ;;  %v1563_v26 = vmul.f32 %v1430_v22, %v1557_v23  ;;  %v1567_v28 = vmul.f32 %v1431_v24, %v1557_v23  ;;  %v69_v33 = vmul.f32 %v1557_v23, %v1557_v23 }
  0x31   :  { %v72_v36 = vmul.f32 21.0, %v1557_v23  ;;  %vm78_vm2 = vcmp.lt.f32.partialorder %v1557_v23, 1.0 }
  0x32   :  { %v87_v27 = vand.u32 2147483647, %v1560_v25  ;;  %v90_v29 = vand.u32 2139095040, %v1560_v25  ;;  %v250_v30 = vand.u32 2139095040, %v1563_v26  ;;  %v247_v32 = vand.u32 2147483647, %v1563_v26 }
  0x33   :  { %v411_v37 = vand.u32 2139095040, %v1567_v28  ;;  %v70_v42 = vmul.f32 %v69_v33, %v69_v33  ;;  %v73_v45 = vsub.f32 48.0, %v72_v36 }
  0x34   :  { %v94_v31 = vand.u32 8388607, %v87_v27  ;;  %v91_v34 = vshrl.u32 %v90_v29, 23  ;;  %v251_v35 = vshrl.u32 %v250_v30, 23  ;;  %v254_v41 = vand.u32 8388607, %v247_v32 }
  0x35   :  { %v412_v46 = vshrl.u32 %v411_v37, 23  ;;  %v1582_v51 = vmul.f32 %v70_v42, %v69_v33  ;;  %v1585_v53 = vmul.f32 %v73_v45, %v1557_v23 }
  0x36   :  { %v1392_v38 = vadd.s32 4294967169, %v91_v34  ;;  %v1395_v39 = vadd.s32 4294967169, %v251_v35  ;;  %v95_v40 = vor.u32 8388608, %v94_v31  ;;  %v255_v49 = vor.u32 8388608, %v254_v41 }
  0x37   :  { %v1591_v56 = vadd.s32 4294967169, %v412_v46 }
  0x38   :  { %v97_v43 = vadd.s32 1, %v1392_v38  ;;  %v257_v44 = vadd.s32 1, %v1395_v39  ;;  %v1580_v48 = vshll.u32 %v95_v40, 8  ;;  %v1599_v5 = vshll.u32 %v255_v49, 8 }
  0x3a   :  { %vm98_vm3 = vcmp.gt.s32.totalorder %v97_v43, 0  ;;  %vm258_vm4 = vcmp.gt.s32.totalorder %v257_v44, 0  ;;  %v136_v4 = vand.u32 65535, %v1580_v48  ;;  %v137_v9 = vshrl.u32 %v1580_v48, 16 }
  0x3b   :  { %v99_v47 = vsel %vm98_vm3, %v97_v43, 0  ;;  %v259_v50 = vsel %vm258_vm4, %v257_v44, 0 }
  0x3c   :  { %v101_v52 = vand.u32 31, %v99_v47  ;;  %v1587_v54 = vshrl.u32 %v99_v47, 5  ;;  %v1589_v55 = vand.u32 31, %v259_v50  ;;  %v1619_v24 = vshrl.u32 %v259_v50, 5 }
  0x3e   :  { %v102_v57 = vsub.s32 32, %v101_v52  ;;  %v104_v59 = vshll.u32 %v1521_v58, %v101_v52  ;;  %v107_v61 = vshll.u32 %v1522_v60, %v101_v52  ;;  %v110_v63 = vshll.u32 %v1523_v62, %v101_v52 }
  0x3f   :  { %v113_v1 = vshll.u32 %v1524_v0, %v101_v52  ;;  %v116_v3 = vshll.u32 %v1525_v2, %v101_v52  ;;  %vm119_vm5 = vcmp.lt.s32.totalorder %v1587_v54, 1  ;;  %vm122_vm6 = vcmp.lt.s32.totalorder %v1587_v54, 4 }
  0x40   :  { %v105_v6 = vshrl.u32 %v1522_v60, %v102_v57  ;;  %v108_v7 = vshrl.u32 %v1523_v62, %v102_v57  ;;  %v111_v8 = vshrl.u32 %v1524_v0, %v102_v57  ;;  %v114_v10 = vshrl.u32 %v1525_v2, %v102_v57 }
  0x41   :  { %v117_v12 = vshrl.u32 %v1526_v11, %v102_v57  ;;  %v1610_v16 = vsub.s32 32, %v1589_v55  ;;  %v103_v17 = vshrl.u32 %v1521_v58, %v102_v57  ;;  %vm121_vm7 = vcmp.lt.s32.totalorder %v1587_v54, 3 }
  0x42   :  { %v106_v13 = vor.u32 %v105_v6, %v104_v59  ;;  %v109_v14 = vor.u32 %v108_v7, %v107_v61  ;;  %v112_v15 = vor.u32 %v111_v8, %v110_v63  ;;  %v115_v18 = vor.u32 %v114_v10, %v113_v1 }
  0x43   :  { %v118_v20 = vor.u32 %v117_v12, %v116_v3  ;;  %vm120_vm8 = vcmp.lt.s32.totalorder %v1587_v54, 2  ;;  %v264_v31 = vshll.u32 %v1521_v58, %v1589_v55  ;;  %v267_v33 = vshll.u32 %v1522_v60, %v1589_v55 }
  0x44   :  { %v127_v21 = vsel %vm119_vm5, %v106_v13, %v109_v14  ;;  %v131_v22 = vsel %vm119_vm5, %v109_v14, %v112_v15  ;;  %v128_v29 = vsel %vm122_vm6, %v115_v18, 920167782  ;;  %v124_v34 = vsel %vm122_vm6, %v112_v15, 2102212464 }
  0x45   :  { %v132_v30 = vsel %vm122_vm6, %v118_v20, 1326507024  ;;  %v129_v35 = vsel %vm121_vm7, %v112_v15, %v128_v29  ;;  %v265_v37 = vshrl.u32 %v1522_v60, %v1610_v16  ;;  %v123_v38 = vsel %vm119_vm5, %v103_v17, %v106_v13 }
  0x46   :  { %v133_v36 = vsel %vm121_vm7, %v115_v18, %v132_v30  ;;  %v130_v39 = vsel %vm120_vm8, %v127_v21, %v129_v35  ;;  %v268_v41 = vshrl.u32 %v1523_v62, %v1610_v16  ;;  %v125_v46 = vsel %vm121_vm7, %v109_v14, %v124_v34 }
  0x47   :  { %v134_v40 = vsel %vm120_vm8, %v131_v22, %v133_v36  ;;  %v160_v44 = vand.u32 65535, %v130_v39  ;;  %v161_v45 = vshrl.u32 %v130_v39, 16  ;;  %v1647_v47 = vor.u32 %v265_v37, %v264_v31 }
  0x48   :  { %v138_v42 = vand.u32 65535, %v134_v40  ;;  %v139_v43 = vshrl.u32 %v134_v40, 16  ;;  %v1649_v49 = vor.u32 %v268_v41, %v267_v33  ;;  %v270_v50 = vshll.u32 %v1523_v62, %v1589_v55 }
  0x49   :  { %v271_v61 = vshrl.u32 %v1524_v0, %v1610_v16  ;;  %v162_v1 = vmul.u32 %v160_v44, %v136_v4  ;;  %v163_v3 = vmul.u32 %v161_v45, %v136_v4  ;;  %v164_v6 = vmul.u32 %v160_v44, %v137_v9 }
  0x4a   :  { %v140_v52 = vmul.u32 %v138_v42, %v136_v4  ;;  %v141_v57 = vmul.u32 %v139_v43, %v136_v4  ;;  %v142_v59 = vmul.u32 %v138_v42, %v137_v9  ;;  %v143_v63 = vmul.u32 %v139_v43, %v137_v9 }
  0x4b   :  { %v165_v12 = vmul.u32 %v161_v45, %v137_v9  ;;  %v166_v14 = vshll.u32 %v163_v3, 16  ;;  %v167_v15 = vshrl.u32 %v163_v3, 16  ;;  %v168_v17 = vshll.u32 %v164_v6, 16 }
  0x4c   :  { %v144_v7 = vshll.u32 %v141_v57, 16  ;;  %v145_v8 = vshrl.u32 %v141_v57, 16  ;;  %v146_v10 = vshll.u32 %v142_v59, 16  ;;  %v147_v13 = vshrl.u32 %v142_v59, 16 }
  0x4d   :  { %v169_v20 = vshrl.u32 %v164_v6, 16  ;;  %v273_v21 = vshll.u32 %v1524_v0, %v1589_v55  ;;  %v1527_v22 = vmov 0   ;;  %vm170_vm10 = vc.u32 %v162_v1, %v166_v14 }
  0x4e   :  { %vm148_vm9 = vc.u32 %v140_v52, %v144_v7  ;;  %v150_v18 = vadd.s32 %v144_v7, %v140_v52  ;;  %v172_v4 = vadd.s32 %v166_v14, %v162_v1  ;;  %v274_v30 = vshrl.u32 %v1525_v2, %v1610_v16 }
  0x4f   :  { %v149_v29 = vsel %vm148_vm9, 1, %v1527_v22  ;;  %v171_v9 = vsel %vm170_vm10, 1, %v1527_v22  ;;  %v276_v33 = vshll.u32 %v1525_v2, %v1589_v55  ;;  %v272_v36 = vor.u32 %v271_v61, %v270_v50 }
  0x50   :  { %v151_v31 = vadd.s32 %v149_v29, %v143_v63  ;;  %vm152_vm11 = vc.u32 %v150_v18, %v146_v10  ;;  %v173_v35 = vadd.s32 %v171_v9, %v165_v12  ;;  %vm174_vm12 = vc.u32 %v172_v4, %v168_v17 }
  0x51   :  { %v153_v34 = vsel %vm152_vm11, 1, %v1527_v22  ;;  %v175_v39 = vsel %vm174_vm12, 1, %v1527_v22  ;;  %v275_v40 = vor.u32 %v274_v30, %v273_v21  ;;  %v277_v41 = vshrl.u32 %v1526_v11, %v1610_v16 }
  0x52   :  { %v155_v37 = vadd.s32 %v153_v34, %v151_v31  ;;  %v1667_v42 = vadd.s32 %v172_v4, %v168_v17  ;;  %v177_v43 = vadd.s32 %v175_v39, %v173_v35  ;;  %vm279_vm13 = vcmp.lt.s32.totalorder %v1619_v24, 1 }
  0x53   :  { %vm281_vm14 = vcmp.lt.s32.totalorder %v1619_v24, 3  ;;  %v278_v44 = vor.u32 %v277_v41, %v276_v33  ;;  %vm280_vm15 = vcmp.lt.s32.totalorder %v1619_v24, 2  ;;  %vm282_vm0 = vcmp.lt.s32.totalorder %v1619_v24, 4 }
  0x54   :  { %v156_v55 = vadd.s32 %v155_v37, %v145_v8  ;;  %v126_v45 = vsel %vm120_vm8, %v123_v38, %v125_v46  ;;  %v178_v50 = vadd.s32 %v177_v43, %v167_v15  ;;  %v287_v52 = vsel %vm279_vm13, %v1647_v47, %v1649_v49 }
  0x55   :  { %v288_v57 = vsel %vm282_vm0, %v275_v40, 920167782  ;;  %v291_v63 = vsel %vm279_vm13, %v1649_v49, %v272_v36  ;;  %v296_v54 = vand.u32 65535, %v1599_v5  ;;  %v292_v1 = vsel %vm282_vm0, %v278_v44, 1326507024 }
  0x56   :  { %v1681_v59 = vadd.s32 %v156_v55, %v147_v13  ;;  %v289_v61 = vsel %vm281_vm14, %v272_v36, %v288_v57  ;;  %v179_v38 = vadd.s32 %v178_v50, %v169_v20  ;;  %v297_v3 = vshrl.u32 %v1599_v5, 16 }
  0x57   :  { %v290_v46 = vsel %vm280_vm15, %v287_v52, %v289_v61  ;;  %v180_v6 = vmul.u32 %v1580_v48, %v126_v45  ;;  %v293_v7 = vsel %vm281_vm14, %v275_v40, %v292_v1  ;;  %v418_v14 = vadd.s32 1, %v1591_v56 }
  0x58   :  { %vm182_vm1 = vc.u32 %v1681_v59, %v1667_v42  ;;  %v320_v8 = vand.u32 65535, %v290_v46  ;;  %v183_v10 = vadd.s32 1, %v179_v38  ;;  %v294_v12 = vsel %vm280_vm15, %v291_v63, %v293_v7 }
  0x59   :  { %v321_v13 = vshrl.u32 %v290_v46, 16  ;;  %v263_v15 = vshrl.u32 %v1521_v58, %v1610_v16  ;;  %v298_v17 = vand.u32 65535, %v294_v12  ;;  %v299_v18 = vshrl.u32 %v294_v12, 16 }
  0x5a   :  { %v408_v48 = vand.u32 2147483647, %v1567_v28  ;;  %v184_v20 = vsel %vm182_vm1, %v183_v10, %v179_v38  ;;  %v284_v21 = vsel %vm282_vm0, %v272_v36, 2102212464  ;;  %v324_v4 = vmul.u32 %v320_v8, %v297_v3 }
  0x5b   :  { %v323_v29 = vmul.u32 %v321_v13, %v296_v54  ;;  %v185_v30 = vadd.s32 %v184_v20, %v180_v6  ;;  %v300_v31 = vmul.u32 %v298_v17, %v296_v54  ;;  %v301_v9 = vmul.u32 %v299_v18, %v296_v54 }
  0x5c   :  { %v322_v33 = vmul.u32 %v320_v8, %v296_v54  ;;  %v75_v34 = vadd.f32 -28.0, %v1585_v53  ;;  %v302_v56 = vmul.u32 %v298_v17, %v297_v3  ;;  %vm419_vm3 = vcmp.gt.s32.totalorder %v418_v14, 0 }
  0x5d   :  { %v326_v16 = vshll.u32 %v323_v29, 16  ;;  %v186_v35 = vadd.s32 536870912, %v185_v30  ;;  %v283_v37 = vsel %vm279_vm13, %v263_v15, %v1647_v47  ;;  %v303_v39 = vmul.u32 %v299_v18, %v297_v3 }
  0x5e   :  { %v304_v36 = vshll.u32 %v301_v9, 16  ;;  %v285_v40 = vsel %vm281_vm14, %v1649_v49, %v284_v21  ;;  %v306_v41 = vshll.u32 %v302_v56, 16  ;;  %v325_v43 = vmul.u32 %v321_v13, %v297_v3 }
  0x5f   :  { %v328_v55 = vshll.u32 %v324_v4, 16  ;;  %v1715_v53 = vshrl.u32 %v186_v35, 30  ;;  %vm330_vm5 = vc.u32 %v322_v33, %v326_v16  ;;  %v332_v52 = vadd.s32 %v326_v16, %v322_v33 }
  0x60   :  { %vm308_vm4 = vc.u32 %v300_v31, %v304_v36  ;;  %v310_v44 = vadd.s32 %v304_v36, %v300_v31  ;;  %v331_v50 = vsel %vm330_vm5, 1, %v1527_v22  ;;  %v420_v47 = vsel %vm419_vm3, %v418_v14, 0 }
  0x61   :  { %v309_v45 = vsel %vm308_vm4, 1, %v1527_v22  ;;  %v188_v57 = vshll.u32 %v1715_v53, 30  ;;  %v305_v61 = vshrl.u32 %v301_v9, 16  ;;  %v327_v54 = vshrl.u32 %v323_v29, 16 }
  0x62   :  { %v311_v63 = vadd.s32 %v309_v45, %v303_v39  ;;  %vm312_vm6 = vc.u32 %v310_v44, %v306_v41  ;;  %v333_v38 = vadd.s32 %v331_v50, %v325_v43  ;;  %vm334_vm7 = vc.u32 %v332_v52, %v328_v55 }
  0x63   :  { %v313_v49 = vsel %vm312_vm6, 1, %v1527_v22  ;;  %v1722_v46 = vsub.s32 %v185_v30, %v188_v57  ;;  %v307_v1 = vshrl.u32 %v302_v56, 16  ;;  %v335_v6 = vsel %vm334_vm7, 1, %v1527_v22 }
  0x64   :  { %v315_v3 = vadd.s32 %v313_v49, %v311_v63  ;;  %v76_v7 = vmul.f32 %v75_v34, %v1582_v51  ;;  %v329_v8 = vshrl.u32 %v324_v4, 16  ;;  %v337_v10 = vadd.s32 %v335_v6, %v333_v38 }
  0x65   :  { %v422_v12 = vand.u32 31, %v420_v47  ;;  %vm190_vm8 = vcmp.lt.s32.totalorder %v1722_v46, 0  ;;  %v191_v13 = vsub.s32 0, %v1722_v46  ;;  %v1728_v15 = vadd.s32 %v332_v52, %v328_v55 }
  0x66   :  { %v316_v14 = vadd.s32 %v315_v3, %v305_v61  ;;  %v82_v17 = vmul.f32 0.5, %v1554_v19  ;;  %v286_v18 = vsel %vm280_vm15, %v283_v37, %v285_v40  ;;  %v338_v20 = vadd.s32 %v337_v10, %v327_v54 }
  0x67   :  { %v1528_v21 = vmov 0.0   ;;  %v192_v29 = vsel %vm190_vm8, %v191_v13, %v1722_v46  ;;  %v423_v30 = vsub.s32 32, %v422_v12  ;;  %v77_v31 = vadd.f32 1.0, %v76_v7 }
  0x68   :  { %v1391_v51 = vsel %vm78_vm2, 1.0, %v1528_v21  ;;  %v1736_v4 = vadd.s32 %v316_v14, %v307_v1  ;;  %v193_v9 = vclz %v192_v29  ;;  %v339_v33 = vadd.s32 %v338_v20, %v329_v8 }
  0x69   :  { %v415_v34 = vand.u32 8388607, %v408_v48  ;;  %vm89_vm9 = vcmp.lt.s32.totalorder %v1560_v25, 0  ;;  %v181_v19 = vadd.s32 %v1667_v42, %v1681_v59  ;;  %v340_v24 = vmul.u32 %v1599_v5, %v286_v18 }
  0x6a   :  { %vm342_vm10 = vc.u32 %v1736_v4, %v1728_v15  ;;  %v1746_v56 = vshrl.u32 %v420_v47, 5  ;;  %v1393_v16 = vadd.s32 4294967294, %v193_v9  ;;  %v211_v35 = vsub.s32 4, %v1715_v53 }
  0x6b   :  { %v343_v37 = vadd.s32 1, %v339_v33  ;;  %v425_v39 = vshll.u32 %v1521_v58, %v422_v12  ;;  %v428_v36 = vshll.u32 %v1522_v60, %v422_v12  ;;  %v429_v40 = vshrl.u32 %v1523_v62, %v423_v30 }
  0x6c   :  { %v431_v41 = vshll.u32 %v1523_v62, %v422_v12  ;;  %v434_v42 = vshll.u32 %v1524_v0, %v422_v12  ;;  %vm1756_vm11 = vcmp.le.f32.partialorder %v87_v27, 0.7853982  ;;  %vm1394_vm12 = vcmp.lt.s32.totalorder %v1393_v16, 0 }
  0x6d   :  { %v344_v59 = vsel %vm342_vm10, %v343_v37, %v339_v33  ;;  %v432_v43 = vshrl.u32 %v1524_v0, %v423_v30  ;;  %v435_v55 = vshrl.u32 %v1525_v2, %v423_v30  ;;  %v196_v44 = vsel %vm1394_vm12, 0, %v1393_v16 }
  0x6e   :  { %v345_v45 = vadd.s32 %v344_v59, %v340_v24  ;;  %v437_v50 = vshll.u32 %v1525_v2, %v422_v12  ;;  %v438_v52 = vshrl.u32 %v1526_v11, %v423_v30  ;;  %v197_v47 = vsub.s32 32, %v196_v44 }
  0x6f   :  { %v198_v57 = vshll.u32 %v1722_v46, %v196_v44  ;;  %v201_v61 = vsub.s32 4294967266, %v196_v44  ;;  %v426_v27 = vshrl.u32 %v1522_v60, %v423_v30  ;;  %v81_v63 = vmul.f32 %v1391_v51, %v77_v31 }
  0x70   :  { %v346_v49 = vadd.s32 536870912, %v345_v45  ;;  %v416_v54 = vor.u32 8388608, %v415_v34  ;;  %v430_v38 = vor.u32 %v429_v40, %v428_v36  ;;  %v199_v1 = vshrl.u32 %v181_v19, %v197_v47 }
  0x71   :  { %v202_v3 = vadd.s32 127, %v201_v61  ;;  %v433_v6 = vor.u32 %v432_v43, %v431_v41  ;;  %v436_v7 = vor.u32 %v435_v55, %v434_v42  ;;  %v439_v10 = vor.u32 %v438_v52, %v437_v50 }
  0x72   :  { %v1766_v8 = vshrl.u32 %v346_v49, 30  ;;  %vm440_vm13 = vcmp.lt.s32.totalorder %v1746_v56, 1  ;;  %vm443_vm14 = vcmp.lt.s32.totalorder %v1746_v56, 4  ;;  %v200_v12 = vor.u32 %v199_v1, %v198_v57 }
  0x73   :  { %v203_v46 = vshll.u32 %v202_v3, 23  ;;  %v212_v13 = vsel %vm89_vm9, %v211_v35, %v1715_v53  ;;  %v427_v14 = vor.u32 %v426_v27, %v425_v39  ;;  %v1773_v18 = vmul.f32 %v82_v17, %v81_v63 }
  0x74   :  { %v348_v20 = vshll.u32 %v1766_v8, 30  ;;  %vm441_vm15 = vcmp.lt.s32.totalorder %v1746_v56, 2  ;;  %vm442_vm0 = vcmp.lt.s32.totalorder %v1746_v56, 3  ;;  %v207_v51 = vcvt.s32.f32 %v200_v12 }
  0x75   :  { %v204_v21 = vor.u32 4788187, %v203_v46  ;;  %v449_v29 = vsel %vm443_vm14, %v436_v7, 920167782  ;;  %v452_v31 = vsel %vm440_vm13, %v430_v38, %v433_v6  ;;  %v214_v53 = vsel %vm1756_vm11, 0, %v212_v13 }
  0x76   :  { %v1784_v9 = vsub.s32 %v345_v45, %v348_v20  ;;  %v424_v17 = vshrl.u32 %v1521_v58, %v423_v30  ;;  %v453_v33 = vsel %vm443_vm14, %v439_v10, 1326507024  ;;  %v448_v19 = vsel %vm440_vm13, %v427_v14, %v430_v38 }
  0x77   :  { %v205_v34 = vand.u32 2147483647, %v204_v21  ;;  %v454_v24 = vsel %vm442_vm0, %v436_v7, %v453_v33  ;;  %v1793_v16 = vshll.u32 %v416_v54, 8  ;;  %v450_v37 = vsel %vm442_vm0, %v433_v6, %v449_v29 }
  0x78   :  { %vm350_vm1 = vcmp.lt.s32.totalorder %v1784_v9, 0  ;;  %v351_v35 = vsub.s32 0, %v1784_v9  ;;  %v455_v30 = vsel %vm441_vm15, %v452_v31, %v454_v24  ;;  %v231_v36 = vadd.s32 3, %v214_v53 }
  0x79   :  { %v208_v39 = vmul.f32 %v207_v51, %v205_v34  ;;  %v457_v40 = vand.u32 65535, %v1793_v16  ;;  %v458_v41 = vshrl.u32 %v1793_v16, 16  ;;  %v341_v42 = vadd.s32 %v1728_v15, %v1736_v4 }
  0x7a   :  { %v352_v59 = vsel %vm350_vm1, %v351_v35, %v1784_v9  ;;  %v459_v43 = vand.u32 65535, %v455_v30  ;;  %v460_v55 = vshrl.u32 %v455_v30, 16  ;;  %v445_v50 = vsel %vm443_vm14, %v433_v6, 2102212464 }
  0x7b   :  { %v209_v44 = vxor.u32 2147483648, %v208_v39  ;;  %v353_v45 = vclz %v352_v59  ;;  %v451_v52 = vsel %vm441_vm15, %v448_v19, %v450_v37  ;;  %v1816_v4 = vand.u32 3, %v231_v36 }
  0x7c   :  { %v461_v47 = vmul.u32 %v459_v43, %v457_v40  ;;  %v1810_v57 = vmul.u32 %v460_v55, %v457_v40  ;;  %v1812_v61 = vmul.u32 %v459_v43, %v458_v41  ;;  %v481_v27 = vand.u32 65535, %v451_v52 }
  0x7d   :  { %v210_v15 = vsel %vm89_vm9, %v209_v44, %v208_v39  ;;  %v1396_v63 = vadd.s32 4294967294, %v353_v45  ;;  %v444_v49 = vsel %vm440_vm13, %v424_v17, %v427_v14  ;;  %v482_v6 = vshrl.u32 %v451_v52, 16 }
  0x7e   :  { %v1823_v54 = vsel %vm1756_vm11, %v1560_v25, %v210_v15  ;;  %v465_v1 = vshll.u32 %v1810_v57, 16  ;;  %v467_v3 = vshll.u32 %v1812_v61, 16  ;;  %vm249_vm2 = vcmp.lt.s32.totalorder %v1563_v26, 0 }
  0x7f   :  { %v215_v7 = vmul.f32 %v1823_v54, %v1823_v54  ;;  %vm1397_vm3 = vcmp.lt.s32.totalorder %v1396_v63, 0  ;;  %v446_v10 = vsel %vm442_vm0, %v430_v38, %v445_v50  ;;  %v464_v12 = vmul.u32 %v460_v55, %v458_v41 }
  0x80   :  { %v356_v46 = vsel %vm1397_vm3, 0, %v1396_v63  ;;  %vm469_vm4 = vc.u32 %v461_v47, %v465_v1  ;;  %v471_v5 = vadd.s32 %v465_v1, %v461_v47  ;;  %v1832_v13 = vmul.u32 %v481_v27, %v458_v41 }
  0x81   :  { %v216_v14 = vmul.f32 -0.001358992, %v215_v7  ;;  %v223_v20 = vmul.f32 -0.00019511016, %v215_v7  ;;  %v357_v21 = vsub.s32 32, %v356_v46  ;;  %v358_v51 = vshll.u32 %v1784_v9, %v356_v46 }
  0x82   :  { %v361_v29 = vsub.s32 4294967266, %v356_v46  ;;  %v470_v31 = vsel %vm469_vm4, 1, %v1527_v22  ;;  %vm473_vm5 = vc.u32 %v471_v5, %v467_v3  ;;  %v484_v53 = vmul.u32 %v482_v6, %v457_v40 }
  0x83   :  { %v217_v17 = vadd.f32 0.041655596, %v216_v14  ;;  %v224_v33 = vadd.f32 0.008332121, %v223_v20  ;;  %vm1838_vm6 = vcmp.le.f32.partialorder %v247_v32, 0.7853982  ;;  %v359_v34 = vshrl.u32 %v341_v42, %v357_v21 }
  0x84   :  { %v472_v19 = vadd.s32 %v470_v31, %v464_v12  ;;  %vm237_vm7 = vcmp.eq.s32.totalorder %v1816_v4, 2  ;;  %v362_v24 = vadd.s32 127, %v361_v29  ;;  %v371_v9 = vsub.s32 4, %v1766_v8  ;;  %v1433_v29 = vld [vmem:[#allocation2 + $0x4] ss:$0 sm:$0xff] }
  0x85   :  { %v483_v35 = vmul.u32 %v481_v27, %v457_v40  ;;  %v486_v37 = vmul.u32 %v482_v6, %v458_v41  ;;  %v218_v30 = vmul.f32 %v217_v17, %v215_v7  ;;  %v225_v39 = vmul.f32 %v224_v33, %v215_v7 }
  0x86   :  { %v360_v36 = vor.u32 %v359_v34, %v358_v51  ;;  %v474_v59 = vsel %vm473_vm5, 1, %v1527_v22  ;;  %vm234_vm8 = vcmp.eq.s32.totalorder %v1816_v4, 0  ;;  %v363_v32 = vshll.u32 %v362_v24, 23 }
  0x87   :  { %v466_v43 = vshrl.u32 %v1810_v57, 16  ;;  %v476_v55 = vadd.s32 %v474_v59, %v472_v19  ;;  %v487_v42 = vshll.u32 %v484_v53, 16  ;;  %v219_v44 = vadd.f32 -0.4999988, %v218_v30  ;;  %v1432_v57 = vld [vmem:[#allocation2 + $0x3] ss:$0 sm:$0xff] }
  0x88   :  { %v226_v45 = vadd.f32 -0.16666654, %v225_v39  ;;  %v1849_v50 = vsel %vm441_vm15, %v444_v49, %v446_v10  ;;  %v489_v40 = vshll.u32 %v1832_v13, 16  ;;  %vm230_vm9 = vweird.f32 %v1560_v25 }
  0x89   :  { %v364_v41 = vor.u32 4788187, %v363_v32  ;;  %v367_v52 = vcvt.s32.f32 %v360_v36  ;;  %v372_v47 = vsel %vm249_vm2, %v371_v9, %v1766_v8  ;;  %vm491_vm10 = vc.u32 %v483_v35, %v487_v42 }
  0x8a   :  { %v220_v27 = vmul.f32 %v219_v44, %v215_v7  ;;  %v227_v15 = vmul.f32 %v226_v45, %v215_v7  ;;  %v492_v63 = vsel %vm491_vm10, 1, %v1527_v22  ;;  %v493_v1 = vadd.s32 %v487_v42, %v483_v35 }
  0x8b   :  { %v365_v56 = vand.u32 2147483647, %v364_v41  ;;  %v468_v49 = vshrl.u32 %v1812_v61, 16  ;;  %v477_v3 = vadd.s32 %v476_v55, %v466_v43  ;;  %v494_v6 = vadd.s32 %v492_v63, %v486_v37 }
  0x8c   :  { %v221_v10 = vadd.f32 1.0, %v220_v27  ;;  %v228_v12 = vadd.f32 1.0, %v227_v15  ;;  %v488_v46 = vshrl.u32 %v484_v53, 16  ;;  %vm495_vm11 = vc.u32 %v493_v1, %v489_v40 }
  0x8d   :  { %v368_v5 = vmul.f32 %v367_v52, %v365_v56  ;;  %v374_v8 = vsel %vm1838_vm6, 0, %v372_v47  ;;  %v496_v14 = vsel %vm495_vm11, 1, %v1527_v22  ;;  %v1862_v7 = vmul.f32 %v1432_v57, %v1557_v23 }
  0x8e   :  { %v229_v20 = vmul.f32 %v228_v12, %v1823_v54  ;;  %v238_v21 = vxor.u32 2147483648, %v221_v10  ;;  %v490_v61 = vshrl.u32 %v1832_v13, 16  ;;  %v498_v51 = vadd.s32 %v496_v14, %v494_v6 }
  0x8f   :  { %v369_v31 = vxor.u32 2147483648, %v368_v5  ;;  %v1866_v17 = vadd.s32 %v477_v3, %v468_v49  ;;  %v1868_v53 = vadd.s32 %v493_v1, %v489_v40  ;;  %v572_v33 = vand.u32 2139095040, %v1862_v7 }
  0x90   :  { %vm233_vm12 = vcmp.lt.s32.totalorder %v1816_v4, 2  ;;  %v235_v34 = vxor.u32 2147483648, %v229_v20  ;;  %v239_v19 = vsel %vm237_vm7, %v238_v21, %v229_v20  ;;  %v499_v24 = vadd.s32 %v498_v51, %v488_v46 }
  0x91   :  { %v370_v54 = vsel %vm249_vm2, %v369_v31, %v368_v5  ;;  %v391_v13 = vadd.s32 3, %v374_v8  ;;  %v501_v9 = vmul.u32 %v1793_v16, %v1849_v50  ;;  %v573_v35 = vshrl.u32 %v572_v33, 23 }
  0x92   :  { %v236_v37 = vsel %vm234_vm8, %v221_v10, %v235_v34  ;;  %v373_v30 = vsel %vm1838_vm6, %v1563_v26, %v370_v54  ;;  %v500_v39 = vadd.s32 %v499_v24, %v490_v61  ;;  %v1884_v36 = vmul.f32 %v1433_v29, %v1557_v23 }
  0x93   :  { %v240_v59 = vsel %vm233_vm12, %v236_v37, %v239_v19  ;;  %v375_v32 = vmul.f32 %v373_v30, %v373_v30  ;;  %vm503_vm13 = vc.u32 %v1866_v17, %v1868_v53  ;;  %v1401_v43 = vadd.s32 4294967169, %v573_v35 }
  0x94   :  { %v241_v16 = vsel %vm230_vm9, nan, %v240_v59  ;;  %v504_v55 = vadd.s32 1, %v500_v39  ;;  %v1891_v45 = vand.u32 3, %v391_v13  ;;  %v569_v40 = vand.u32 2147483647, %v1862_v7 }
  0x95   :  { %v242_v4 = vmul.f32 %v241_v16, %v1773_v18  ;;  %v376_v42 = vmul.f32 -0.001358992, %v375_v32  ;;  %v383_v44 = vmul.f32 -0.00019511016, %v375_v32  ;;  %v579_v38 = vadd.s32 1, %v1401_v43 }
  0x96   :  { %v505_v50 = vsel %vm503_vm13, %v504_v55, %v500_v39  ;;  %v733_v41 = vand.u32 2139095040, %v1884_v36  ;;  %vm394_vm15 = vcmp.eq.s32.totalorder %v1891_v45, 0  ;;  %v576_v1 = vand.u32 8388607, %v569_v40 }
  0x97   :  { %243 = vst [vmem:[#allocation7] sm:$0xff] %v242_v4  ;;  %v377_v52 = vadd.f32 0.041655596, %v376_v42  ;;  %v384_v47 = vadd.f32 0.008332121, %v383_v44  ;;  %v506_v57 = vadd.s32 %v505_v50, %v501_v9  ;;  %vm580_vm14 = vcmp.gt.s32.totalorder %v579_v38, 0 }
  0x98   :  { %v581_v25 = vsel %vm580_vm14, %v579_v38, 0  ;;  %vm393_vm0 = vcmp.lt.s32.totalorder %v1891_v45, 2  ;;  %v734_v10 = vshrl.u32 %v733_v41, 23  ;;  %vm390_vm1 = vweird.f32 %v1563_v26 }
  0x99   :  { %v378_v27 = vmul.f32 %v377_v52, %v375_v32  ;;  %v385_v15 = vmul.f32 %v384_v47, %v375_v32  ;;  %v507_v63 = vadd.s32 536870912, %v506_v57  ;;  %v583_v56 = vand.u32 31, %v581_v25 }
  0x9a   :  { %v1902_v12 = vshrl.u32 %v581_v25, 5  ;;  %vm397_vm2 = vcmp.eq.s32.totalorder %v1891_v45, 2  ;;  %v577_v61 = vor.u32 8388608, %v576_v1  ;;  %v1404_v9 = vadd.s32 4294967169, %v734_v10 }
  0x9b   :  { %v379_v49 = vadd.f32 -0.4999988, %v378_v27  ;;  %v386_v3 = vadd.f32 -0.16666654, %v385_v15  ;;  %v1899_v6 = vshrl.u32 %v507_v63, 30  ;;  %v1904_v46 = vsub.s32 32, %v583_v56 }
  0x9c   :  { %v586_v5 = vshll.u32 %v1521_v58, %v583_v56  ;;  %v589_v8 = vshll.u32 %v1522_v60, %v583_v56  ;;  %v592_v31 = vshll.u32 %v1523_v62, %v583_v56  ;;  %vm601_vm3 = vcmp.lt.s32.totalorder %v1902_v12, 1 }
  0x9d   :  { %v380_v14 = vmul.f32 %v379_v49, %v375_v32  ;;  %v387_v20 = vmul.f32 %v386_v3, %v375_v32  ;;  %v509_v21 = vshll.u32 %v1899_v6, 30  ;;  %v587_v51 = vshrl.u32 %v1522_v60, %v1904_v46 }
  0x9e   :  { %v590_v29 = vshrl.u32 %v1523_v62, %v1904_v46  ;;  %v593_v24 = vshrl.u32 %v1524_v0, %v1904_v46  ;;  %v595_v59 = vshll.u32 %v1524_v0, %v583_v56  ;;  %v596_v32 = vshrl.u32 %v1525_v2, %v1904_v46 }
  0x9f   :  { %v381_v33 = vadd.f32 1.0, %v380_v14  ;;  %v388_v34 = vadd.f32 1.0, %v387_v20  ;;  %v510_v19 = vsub.s32 %v506_v57, %v509_v21  ;;  %v1917_v54 = vor.u32 %v587_v51, %v586_v5 }
  0xa0   :  { %v1919_v13 = vor.u32 %v590_v29, %v589_v8  ;;  %v598_v43 = vshll.u32 %v1525_v2, %v583_v56  ;;  %v599_v16 = vshrl.u32 %v1526_v11, %v1904_v46  ;;  %v594_v44 = vor.u32 %v593_v24, %v592_v31 }
  0xa1   :  { %v389_v35 = vmul.f32 %v388_v34, %v373_v30  ;;  %v398_v37 = vxor.u32 2147483648, %v381_v33  ;;  %vm511_vm4 = vcmp.lt.s32.totalorder %v510_v19, 0  ;;  %v512_v39 = vsub.s32 0, %v510_v19 }
  0xa2   :  { %v597_v38 = vor.u32 %v596_v32, %v595_v59  ;;  %vm603_vm5 = vcmp.lt.s32.totalorder %v1902_v12, 3  ;;  %v730_v50 = vand.u32 2147483647, %v1884_v36  ;;  %vm410_vm6 = vcmp.lt.s32.totalorder %v1567_v28, 0 }
  0xa3   :  { %v395_v55 = vxor.u32 2147483648, %v389_v35  ;;  %v399_v4 = vsel %vm397_vm2, %v398_v37, %v389_v35  ;;  %v513_v42 = vsel %vm511_vm4, %v512_v39, %v510_v19  ;;  %v600_v52 = vor.u32 %v599_v16, %v598_v43 }
  0xa4   :  { %v514_v30 = vclz %v513_v42  ;;  %vm602_vm7 = vcmp.lt.s32.totalorder %v1902_v12, 2  ;;  %vm604_vm8 = vcmp.lt.s32.totalorder %v1902_v12, 4  ;;  %v609_v25 = vsel %vm601_vm3, %v1917_v54, %v1919_v13 }
  0xa5   :  { %v396_v41 = vsel %vm394_vm15, %v381_v33, %v395_v55  ;;  %v610_v27 = vsel %vm604_vm8, %v597_v38, 920167782  ;;  %v1949_v1 = vshll.u32 %v577_v61, 8  ;;  %v740_v56 = vadd.s32 1, %v1404_v9 }
  0xa6   :  { %v400_v47 = vsel %vm393_vm0, %v396_v41, %v399_v4  ;;  %v1399_v57 = vadd.s32 4294967294, %v514_v30  ;;  %v611_v63 = vsel %vm603_vm5, %v594_v44, %v610_v27  ;;  %vm1954_vm9 = vcmp.le.f32.partialorder %v408_v48, 0.7853982 }
  0xa7   :  { %v401_v15 = vsel %vm390_vm1, nan, %v400_v47  ;;  %v502_v3 = vadd.s32 %v1868_v53, %v1866_v17  ;;  %v1962_v26 = vand.u32 8388607, %v730_v50  ;;  %v532_v5 = vsub.s32 4, %v1899_v6 }
  0xa8   :  { %v402_v45 = vmul.f32 %v401_v15, %v1773_v18  ;;  %vm1400_vm10 = vcmp.lt.s32.totalorder %v1399_v57, 0  ;;  %v612_v8 = vsel %vm602_vm7, %v609_v25, %v611_v63  ;;  %v613_v48 = vsel %vm601_vm3, %v1919_v13, %v594_v44 }
  0xa9   :  { %v517_v10 = vsel %vm1400_vm10, 0, %v1399_v57  ;;  %v614_v17 = vsel %vm604_vm8, %v600_v52, 1326507024  ;;  %v618_v61 = vand.u32 65535, %v1949_v1  ;;  %v619_v51 = vshrl.u32 %v1949_v1, 16 }
  0xaa   :  { %404 = vst [vmem:[#allocation7 + $0x8] sm:$0xff] %v402_v45  ;;  %v518_v14 = vsub.s32 32, %v517_v10  ;;  %v519_v20 = vshll.u32 %v510_v19, %v517_v10  ;;  %v522_v21 = vsub.s32 4294967266, %v517_v10  ;;  %v615_v53 = vsel %vm603_vm5, %v597_v38, %v614_v17 }
  0xab   :  { %vm741_vm11 = vcmp.gt.s32.totalorder %v740_v56, 0  ;;  %v616_v33 = vsel %vm602_vm7, %v613_v48, %v615_v53  ;;  %v642_v34 = vand.u32 65535, %v612_v8  ;;  %v585_v19 = vshrl.u32 %v1521_v58, %v1904_v46 }
  0xac   :  { %v520_v29 = vshrl.u32 %v502_v3, %v518_v14  ;;  %v523_v31 = vadd.s32 127, %v522_v21  ;;  %v620_v24 = vand.u32 65535, %v616_v33  ;;  %v621_v9 = vshrl.u32 %v616_v33, 16 }
  0xad   :  { %v643_v35 = vshrl.u32 %v612_v8, 16  ;;  %v533_v59 = vsel %vm410_vm6, %v532_v5, %v1899_v6  ;;  %v606_v32 = vsel %vm604_vm8, %v594_v44, 2102212464  ;;  %v646_v4 = vmul.u32 %v642_v34, %v619_v51 }
  0xae   :  { %v521_v37 = vor.u32 %v520_v29, %v519_v20  ;;  %v524_v39 = vshll.u32 %v523_v31, 23  ;;  %v622_v43 = vmul.u32 %v620_v24, %v618_v61  ;;  %v623_v16 = vmul.u32 %v621_v9, %v618_v61 }
  0xaf   :  { %v624_v55 = vmul.u32 %v620_v24, %v619_v51  ;;  %v644_v38 = vmul.u32 %v642_v34, %v618_v61  ;;  %v645_v46 = vmul.u32 %v643_v35, %v618_v61  ;;  %v535_v41 = vsel %vm1954_vm9, 0, %v533_v59 }
  0xb0   :  { %v525_v42 = vor.u32 4788187, %v524_v39  ;;  %v528_v30 = vcvt.s32.f32 %v521_v37  ;;  %v605_v52 = vsel %vm601_vm3, %v585_v19, %v1917_v54  ;;  %v625_v47 = vmul.u32 %v621_v9, %v619_v51 }
  0xb1   :  { %v626_v6 = vshll.u32 %v623_v16, 16  ;;  %v628_v25 = vshll.u32 %v624_v55, 16  ;;  %v647_v44 = vmul.u32 %v643_v35, %v619_v51  ;;  %v648_v27 = vshll.u32 %v645_v46, 16 }
  0xb2   :  { %v526_v57 = vand.u32 2147483647, %v525_v42  ;;  %v607_v15 = vsel %vm603_vm5, %v1919_v13, %v606_v32  ;;  %v650_v45 = vshll.u32 %v646_v4, 16  ;;  %v627_v10 = vshrl.u32 %v623_v16, 16 }
  0xb3   :  { %vm630_vm12 = vc.u32 %v622_v43, %v626_v6  ;;  %v632_v63 = vadd.s32 %v626_v6, %v622_v43  ;;  %vm652_vm13 = vc.u32 %v644_v38, %v648_v27  ;;  %v654_v48 = vadd.s32 %v648_v27, %v644_v38 }
  0xb4   :  { %v529_v3 = vmul.f32 %v528_v30, %v526_v57  ;;  %v631_v5 = vsel %vm630_vm12, 1, %v1527_v22  ;;  %v653_v54 = vsel %vm652_vm13, 1, %v1527_v22  ;;  %v742_v17 = vsel %vm741_vm11, %v740_v56, 0 }
  0xb5   :  { %v633_v8 = vadd.s32 %v631_v5, %v625_v47  ;;  %vm634_vm14 = vc.u32 %v632_v63, %v628_v25  ;;  %v655_v21 = vadd.s32 %v653_v54, %v647_v44  ;;  %v629_v13 = vshrl.u32 %v624_v55, 16 }
  0xb6   :  { %v530_v14 = vxor.u32 2147483648, %v529_v3  ;;  %v635_v20 = vsel %vm634_vm14, 1, %v1527_v22  ;;  %v649_v61 = vshrl.u32 %v645_v46, 16  ;;  %vm656_vm15 = vc.u32 %v654_v48, %v650_v45 }
  0xb7   :  { %v637_v53 = vadd.s32 %v635_v20, %v633_v8  ;;  %v608_v29 = vsel %vm602_vm7, %v605_v52, %v607_v15  ;;  %v657_v31 = vsel %vm656_vm15, 1, %v1527_v22  ;;  %v744_v33 = vand.u32 31, %v742_v17 }
  0xb8   :  { %v531_v51 = vsel %vm410_vm6, %v530_v14, %v529_v3  ;;  %v651_v24 = vshrl.u32 %v646_v4, 16  ;;  %v659_v56 = vadd.s32 %v657_v31, %v655_v21  ;;  %v552_v35 = vadd.s32 3, %v535_v41 }
  0xb9   :  { %v534_v34 = vsel %vm1954_vm9, %v1567_v28, %v531_v51  ;;  %v638_v19 = vadd.s32 %v637_v53, %v627_v10  ;;  %v2005_v37 = vadd.s32 %v654_v48, %v650_v45  ;;  %v2007_v39 = vsub.s32 32, %v744_v33 }
  0xba   :  { %v536_v9 = vmul.f32 %v534_v34, %v534_v34  ;;  %v660_v12 = vadd.s32 %v659_v56, %v649_v61  ;;  %v662_v32 = vmul.u32 %v1949_v1, %v608_v29  ;;  %v2012_v43 = vshrl.u32 %v742_v17, 5 }
  0xbb   :  { %v2009_v59 = vadd.s32 %v638_v19, %v629_v13  ;;  %v747_v49 = vshll.u32 %v1521_v58, %v744_v33  ;;  %v750_v4 = vshll.u32 %v1522_v60, %v744_v33  ;;  %v748_v30 = vshrl.u32 %v1522_v60, %v2007_v39 }
  0xbc   :  { %v537_v16 = vmul.f32 -0.001358992, %v536_v9  ;;  %v544_v55 = vmul.f32 -0.00019511016, %v536_v9  ;;  %v661_v42 = vadd.s32 %v660_v12, %v651_v24  ;;  %v753_v38 = vshll.u32 %v1523_v62, %v744_v33 }
  0xbd   :  { %v756_v46 = vshll.u32 %v1524_v0, %v744_v33  ;;  %vm664_vm0 = vc.u32 %v2009_v59, %v2005_v37  ;;  %v751_v1 = vshrl.u32 %v1523_v62, %v2007_v39  ;;  %v754_v6 = vshrl.u32 %v1524_v0, %v2007_v39 }
  0xbe   :  { %v538_v41 = vadd.f32 0.041655596, %v537_v16  ;;  %v545_v52 = vadd.f32 0.008332121, %v544_v55  ;;  %v665_v47 = vadd.s32 1, %v661_v42  ;;  %v757_v57 = vshrl.u32 %v1525_v2, %v2007_v39 }
  0xbf   :  { %v759_v25 = vshll.u32 %v1525_v2, %v744_v33  ;;  %v738_v15 = vor.u32 8388608, %v1962_v26  ;;  %v760_v63 = vshrl.u32 %v1526_v11, %v2007_v39  ;;  %v553_v45 = vand.u32 3, %v552_v35 }
  0xc0   :  { %v539_v44 = vmul.f32 %v538_v41, %v536_v9  ;;  %v546_v27 = vmul.f32 %v545_v52, %v536_v9  ;;  %v666_v3 = vsel %vm664_vm0, %v665_v47, %v661_v42  ;;  %v2032_v10 = vor.u32 %v748_v30, %v747_v49 }
  0xc1   :  { %v758_v5 = vor.u32 %v757_v57, %v756_v46  ;;  %v667_v48 = vadd.s32 %v666_v3, %v662_v32  ;;  %v2034_v14 = vor.u32 %v751_v1, %v750_v4  ;;  %v2036_v20 = vor.u32 %v754_v6, %v753_v38 }
  0xc2   :  { %v540_v8 = vadd.f32 -0.4999988, %v539_v44  ;;  %v547_v54 = vadd.f32 -0.16666654, %v546_v27  ;;  %v761_v21 = vor.u32 %v760_v63, %v759_v25  ;;  %vm762_vm1 = vcmp.lt.s32.totalorder %v2012_v43, 1 }
  0xc3   :  { %vm765_vm2 = vcmp.lt.s32.totalorder %v2012_v43, 4  ;;  %v668_v13 = vadd.s32 536870912, %v667_v48  ;;  %vm764_vm3 = vcmp.lt.s32.totalorder %v2012_v43, 3  ;;  %vm763_vm4 = vcmp.lt.s32.totalorder %v2012_v43, 2 }
  0xc4   :  { %v541_v26 = vmul.f32 %v540_v8, %v536_v9  ;;  %v548_v17 = vmul.f32 %v547_v54, %v536_v9  ;;  %v771_v53 = vsel %vm765_vm2, %v758_v5, 920167782  ;;  %v2044_v61 = vshll.u32 %v738_v15, 8  ;;  %v1434_v8 = vld [vmem:[#allocation2 + $0x5] ss:$0 sm:$0xff] }
  0xc5   :  { %v2046_v31 = vshrl.u32 %v668_v13, 30  ;;  %v770_v33 = vsel %vm762_vm1, %v2032_v10, %v2034_v14  ;;  %vm554_vm5 = vcmp.lt.s32.totalorder %v553_v45, 2  ;;  %vm558_vm6 = vcmp.eq.s32.totalorder %v553_v45, 2 }
  0xc6   :  { %v542_v51 = vadd.f32 1.0, %v541_v26  ;;  %v549_v29 = vadd.f32 1.0, %v548_v17  ;;  %v772_v19 = vsel %vm764_vm3, %v2036_v20, %v771_v53  ;;  %v775_v24 = vsel %vm765_vm2, %v761_v21, 1326507024 }
  0xc7   :  { %v670_v35 = vshll.u32 %v2046_v31, 30  ;;  %v774_v12 = vsel %vm762_vm1, %v2034_v14, %v2036_v20  ;;  %vm555_vm7 = vcmp.eq.s32.totalorder %v553_v45, 0  ;;  %v773_v32 = vsel %vm763_vm4, %v770_v33, %v772_v19 }
  0xc8   :  { %v550_v56 = vmul.f32 %v549_v29, %v534_v34  ;;  %v559_v9 = vxor.u32 2147483648, %v542_v51  ;;  %v776_v16 = vsel %vm764_vm3, %v758_v5, %v775_v24  ;;  %v779_v55 = vand.u32 65535, %v2044_v61 }
  0xc9   :  { %v671_v34 = vsub.s32 %v667_v48, %v670_v35  ;;  %v780_v42 = vshrl.u32 %v2044_v61, 16  ;;  %vm551_vm8 = vweird.f32 %v1567_v28  ;;  %v777_v30 = vsel %vm763_vm4, %v774_v12, %v776_v16 }
  0xca   :  { %v556_v49 = vxor.u32 2147483648, %v550_v56  ;;  %v560_v4 = vsel %vm558_vm6, %v559_v9, %v550_v56  ;;  %v803_v38 = vand.u32 65535, %v773_v32  ;;  %v804_v46 = vshrl.u32 %v773_v32, 16 }
  0xcb   :  { %vm672_vm9 = vcmp.lt.s32.totalorder %v671_v34, 0  ;;  %v673_v52 = vsub.s32 0, %v671_v34  ;;  %v781_v1 = vand.u32 65535, %v777_v30  ;;  %v782_v6 = vshrl.u32 %v777_v30, 16 }
  0xcc   :  { %v557_v41 = vsel %vm555_vm7, %v542_v51, %v556_v49  ;;  %v2072_v57 = vmul.u32 %v804_v46, %v779_v55  ;;  %v746_v27 = vshrl.u32 %v1521_v58, %v2007_v39  ;;  %vm571_vm10 = vcmp.lt.s32.totalorder %v1862_v7, 0 }
  0xcd   :  { %v561_v47 = vsel %vm554_vm5, %v557_v41, %v560_v4  ;;  %v674_v44 = vsel %vm672_vm9, %v673_v52, %v671_v34  ;;  %v785_v28 = vmul.u32 %v781_v1, %v780_v42  ;;  %v783_v3 = vmul.u32 %v781_v1, %v779_v55 }
  0xce   :  { %v562_v25 = vsel %vm551_vm8, nan, %v561_v47  ;;  %v675_v63 = vclz %v674_v44  ;;  %v784_v5 = vmul.u32 %v782_v6, %v779_v55  ;;  %v663_v45 = vadd.s32 %v2005_v37, %v2009_v59 }
  0xcf   :  { %v563_v15 = vmul.f32 %v562_v25, %v1773_v18  ;;  %v805_v54 = vmul.u32 %v803_v38, %v779_v55  ;;  %v786_v21 = vmul.u32 %v782_v6, %v780_v42  ;;  %v809_v17 = vshll.u32 %v2072_v57, 16 }
  0xd0   :  { %v1402_v48 = vadd.s32 4294967294, %v675_v63  ;;  %v787_v26 = vshll.u32 %v784_v5, 16  ;;  %v693_v39 = vsub.s32 4, %v2046_v31  ;;  %v766_v13 = vsel %vm762_vm1, %v746_v27, %v2032_v10 }
  0xd1   :  { %565 = vst [vmem:[#allocation7 + $0x10] sm:$0xff] %v563_v15  ;;  %v789_v53 = vshll.u32 %v785_v28, 16  ;;  %v807_v51 = vmul.u32 %v803_v38, %v780_v42  ;;  %vm2087_vm11 = vcmp.le.f32.partialorder %v569_v40, 0.7853982  ;;  %v2092_v59 = vmul.f32 %v1434_v8, %v1557_v23 }
  0xd2   :  { %vm1403_vm12 = vcmp.lt.s32.totalorder %v1402_v48, 0  ;;  %vm791_vm13 = vc.u32 %v783_v3, %v787_v26  ;;  %v793_v37 = vadd.s32 %v787_v26, %v783_v3  ;;  %v808_v24 = vmul.u32 %v804_v46, %v780_v42 }
  0xd3   :  { %v678_v33 = vsel %vm1403_vm12, 0, %v1402_v48  ;;  %v792_v19 = vsel %vm791_vm13, 1, %v1527_v22  ;;  %vm813_vm14 = vc.u32 %v805_v54, %v809_v17  ;;  %v767_v40 = vsel %vm765_vm2, %v2036_v20, 2102212464 }
  0xd4   :  { %v679_v10 = vsub.s32 32, %v678_v33  ;;  %v680_v56 = vshll.u32 %v671_v34, %v678_v33  ;;  %v683_v9 = vsub.s32 4294967266, %v678_v33  ;;  %v794_v35 = vadd.s32 %v792_v19, %v786_v21 }
  0xd5   :  { %v788_v12 = vshrl.u32 %v784_v5, 16  ;;  %vm795_vm15 = vc.u32 %v793_v37, %v789_v53  ;;  %v811_v32 = vshll.u32 %v807_v51, 16  ;;  %v814_v4 = vsel %vm813_vm14, 1, %v1527_v22 }
  0xd6   :  { %v681_v16 = vshrl.u32 %v663_v45, %v679_v10  ;;  %v684_v55 = vadd.s32 127, %v683_v9  ;;  %v796_v49 = vsel %vm795_vm15, 1, %v1527_v22  ;;  %v694_v42 = vsel %vm571_vm10, %v693_v39, %v2046_v31  ;;  %v1435_v39 = vld [vmem:[#allocation2 + $0x6] ss:$0 sm:$0xff] }
  0xd7   :  { %v798_v34 = vadd.s32 %v796_v49, %v794_v35  ;;  %v815_v30 = vadd.s32 %v809_v17, %v805_v54  ;;  %v816_v38 = vadd.s32 %v814_v4, %v808_v24  ;;  %v790_v52 = vshrl.u32 %v785_v28, 16 }
  0xd8   :  { %v682_v46 = vor.u32 %v681_v16, %v680_v56  ;;  %v685_v41 = vshll.u32 %v684_v55, 23  ;;  %v894_v20 = vand.u32 2139095040, %v2092_v59  ;;  %v768_v1 = vsel %vm764_vm3, %v2034_v14, %v767_v40 }
  0xd9   :  { %v799_v47 = vadd.s32 %v798_v34, %v788_v12  ;;  %v810_v6 = vshrl.u32 %v2072_v57, 16  ;;  %vm817_vm0 = vc.u32 %v815_v30, %v811_v32  ;;  %v696_v15 = vsel %vm2087_vm11, 0, %v694_v42 }
  0xda   :  { %v686_v25 = vor.u32 4788187, %v685_v41  ;;  %v689_v44 = vcvt.s32.f32 %v682_v46  ;;  %v818_v31 = vsel %vm817_vm0, 1, %v1527_v22  ;;  %v895_v27 = vshrl.u32 %v894_v20, 23 }
  0xdb   :  { %v812_v63 = vshrl.u32 %v807_v51, 16  ;;  %v820_v28 = vadd.s32 %v818_v31, %v816_v38  ;;  %v800_v5 = vadd.s32 %v799_v47, %v790_v52  ;;  %v819_v8 = vadd.s32 %v815_v30, %v811_v32 }
  0xdc   :  { %v687_v3 = vand.u32 2147483647, %v686_v25  ;;  %v1407_v45 = vadd.s32 4294967169, %v895_v27  ;;  %v769_v14 = vsel %vm763_vm4, %v766_v13, %v768_v1  ;;  %v713_v48 = vadd.s32 3, %v696_v15 }
  0xdd   :  { %v821_v54 = vadd.s32 %v820_v28, %v810_v6  ;;  %v891_v17 = vand.u32 2147483647, %v2092_v59  ;;  %v823_v37 = vmul.u32 %v2044_v61, %v769_v14  ;;  %vm825_vm1 = vc.u32 %v800_v5, %v819_v8 }
  0xde   :  { %v690_v57 = vmul.f32 %v689_v44, %v687_v3  ;;  %v901_v21 = vadd.s32 1, %v1407_v45  ;;  %v2117_v43 = vand.u32 3, %v713_v48  ;;  %v2127_v61 = vmul.f32 %v1435_v39, %v1557_v23 }
  0xdf   :  { %v822_v26 = vadd.s32 %v821_v54, %v812_v63  ;;  %v898_v56 = vand.u32 8388607, %v891_v17  ;;  %v2153_v6 = vadd.s32 %v819_v8, %v800_v5  ;;  %vm712_vm7 = vweird.f32 %v1862_v7 }
  0xe0   :  { %v691_v53 = vxor.u32 2147483648, %v690_v57  ;;  %vm902_vm2 = vcmp.gt.s32.totalorder %v901_v21, 0  ;;  %vm719_vm3 = vcmp.eq.s32.totalorder %v2117_v43, 2  ;;  %v1052_v44 = vand.u32 2147483647, %v2127_v61 }
  0xe1   :  { %v826_v51 = vadd.s32 1, %v822_v26  ;;  %v903_v33 = vsel %vm902_vm2, %v901_v21, 0  ;;  %v899_v25 = vor.u32 8388608, %v898_v56  ;;  %v1055_v31 = vand.u32 2139095040, %v2127_v61 }
  0xe2   :  { %v692_v19 = vsel %vm571_vm10, %v691_v53, %v690_v57  ;;  %v905_v13 = vand.u32 31, %v903_v33  ;;  %v2131_v40 = vshrl.u32 %v903_v33, 5  ;;  %vm716_vm4 = vcmp.eq.s32.totalorder %v2117_v43, 0 }
  0xe3   :  { %v2122_v24 = vsel %vm2087_vm11, %v1862_v7, %v692_v19  ;;  %v827_v10 = vsel %vm825_vm1, %v826_v51, %v822_v26  ;;  %vm715_vm5 = vcmp.lt.s32.totalorder %v2117_v43, 2  ;;  %vm732_vm8 = vcmp.lt.s32.totalorder %v1884_v36, 0 }
  0xe4   :  { %v697_v9 = vmul.f32 %v2122_v24, %v2122_v24  ;;  %v828_v35 = vadd.s32 %v827_v10, %v823_v37  ;;  %v2133_v12 = vsub.s32 32, %v905_v13  ;;  %v908_v32 = vshll.u32 %v1521_v58, %v905_v13 }
  0xe5   :  { %v911_v29 = vshll.u32 %v1522_v60, %v905_v13  ;;  %v914_v16 = vshll.u32 %v1523_v62, %v905_v13  ;;  %v917_v55 = vshll.u32 %v1524_v0, %v905_v13  ;;  %v920_v34 = vshll.u32 %v1525_v2, %v905_v13 }
  0xe6   :  { %v698_v49 = vmul.f32 -0.001358992, %v697_v9  ;;  %v705_v4 = vmul.f32 -0.00019511016, %v697_v9  ;;  %v829_v42 = vadd.s32 536870912, %v828_v35  ;;  %v909_v30 = vshrl.u32 %v1522_v60, %v2133_v12 }
  0xe7   :  { %v912_v38 = vshrl.u32 %v1523_v62, %v2133_v12  ;;  %v915_v46 = vshrl.u32 %v1524_v0, %v2133_v12  ;;  %v918_v41 = vshrl.u32 %v1525_v2, %v2133_v12  ;;  %v921_v47 = vshrl.u32 %v1526_v11, %v2133_v12 }
  0xe8   :  { %v699_v52 = vadd.f32 0.041655596, %v698_v49  ;;  %v706_v20 = vadd.f32 0.008332121, %v705_v4  ;;  %v2148_v1 = vshrl.u32 %v829_v42, 30  ;;  %v2158_v28 = vor.u32 %v909_v30, %v908_v32 }
  0xe9   :  { %v2161_v3 = vor.u32 %v912_v38, %v911_v29  ;;  %v916_v45 = vor.u32 %v915_v46, %v914_v16  ;;  %v919_v14 = vor.u32 %v918_v41, %v917_v55  ;;  %v922_v54 = vor.u32 %v921_v47, %v920_v34 }
  0xea   :  { %v700_v27 = vmul.f32 %v699_v52, %v697_v9  ;;  %v707_v15 = vmul.f32 %v706_v20, %v697_v9  ;;  %v831_v63 = vshll.u32 %v2148_v1, 30  ;;  %vm923_vm6 = vcmp.lt.s32.totalorder %v2131_v40, 1 }
  0xeb   :  { %vm925_vm9 = vcmp.lt.s32.totalorder %v2131_v40, 3  ;;  %vm926_vm10 = vcmp.lt.s32.totalorder %v2131_v40, 4  ;;  %v2171_v48 = vshll.u32 %v899_v25, 8  ;;  %v1056_v21 = vshrl.u32 %v1055_v31, 23 }
  0xec   :  { %v701_v5 = vadd.f32 -0.4999988, %v700_v27  ;;  %v708_v8 = vadd.f32 -0.16666654, %v707_v15  ;;  %v2164_v57 = vsub.s32 %v828_v35, %v831_v63  ;;  %vm924_vm12 = vcmp.lt.s32.totalorder %v2131_v40, 2 }
  0xed   :  { %v931_v37 = vsel %vm923_vm6, %v2158_v28, %v2161_v3  ;;  %v932_v51 = vsel %vm926_vm10, %v919_v14, 920167782  ;;  %v936_v33 = vsel %vm926_vm10, %v922_v54, 1326507024  ;;  %v935_v56 = vsel %vm923_vm6, %v2161_v3, %v916_v45 }
  0xee   :  { %v702_v26 = vmul.f32 %v701_v5, %v697_v9  ;;  %v709_v39 = vmul.f32 %v708_v8, %v697_v9  ;;  %vm833_vm11 = vcmp.lt.s32.totalorder %v2164_v57, 0  ;;  %v834_v53 = vsub.s32 0, %v2164_v57 }
  0xef   :  { %vm2190_vm13 = vcmp.le.f32.partialorder %v730_v50, 0.7853982  ;;  %v933_v32 = vsel %vm925_vm9, %v916_v45, %v932_v51  ;;  %v937_v29 = vsel %vm925_vm9, %v919_v14, %v936_v33  ;;  %v1410_v16 = vadd.s32 4294967169, %v1056_v21 }
  0xf0   :  { %v703_v19 = vadd.f32 1.0, %v702_v26  ;;  %v710_v13 = vadd.f32 1.0, %v709_v39  ;;  %v835_v10 = vsel %vm833_vm11, %v834_v53, %v2164_v57  ;;  %v854_v4 = vsub.s32 4, %v2148_v1 }
  0xf1   :  { %v836_v35 = vclz %v835_v10  ;;  %v2202_v42 = vand.u32 8388607, %v1052_v44  ;;  %v934_v34 = vsel %vm924_vm12, %v931_v37, %v933_v32  ;;  %v938_v30 = vsel %vm924_vm12, %v935_v56, %v937_v29 }
  0xf2   :  { %v711_v55 = vmul.f32 %v710_v13, %v2122_v24  ;;  %v720_v49 = vxor.u32 2147483648, %v703_v19  ;;  %v940_v38 = vand.u32 65535, %v2171_v48  ;;  %v941_v41 = vshrl.u32 %v2171_v48, 16 }
  0xf3   :  { %v1405_v50 = vadd.s32 4294967294, %v836_v35  ;;  %v942_v52 = vand.u32 65535, %v938_v30  ;;  %v907_v20 = vshrl.u32 %v1521_v58, %v2133_v12  ;;  %v943_v47 = vshrl.u32 %v938_v30, 16 }
  0xf4   :  { %v717_v46 = vxor.u32 2147483648, %v711_v55  ;;  %v721_v24 = vsel %vm719_vm3, %v720_v49, %v711_v55  ;;  %v1062_v25 = vadd.s32 1, %v1410_v16  ;;  %v2219_v15 = vsel %vm732_vm8, %v854_v4, %v2148_v1 }
  0xf5   :  { %vm1406_vm14 = vcmp.lt.s32.totalorder %v1405_v50, 0  ;;  %v965_v63 = vshrl.u32 %v934_v34, 16  ;;  %v928_v21 = vsel %vm926_vm10, %v916_v45, 2102212464  ;;  %v944_v26 = vmul.u32 %v942_v52, %v940_v38 }
  0xf6   :  { %v718_v31 = vsel %vm716_vm4, %v703_v19, %v717_v46  ;;  %v839_v27 = vsel %vm1406_vm14, 0, %v1405_v50  ;;  %v964_v39 = vand.u32 65535, %v934_v34  ;;  %v945_v51 = vmul.u32 %v943_v47, %v940_v38 }
  0xf7   :  { %v722_v14 = vsel %vm715_vm5, %v718_v31, %v721_v24  ;;  %v840_v54 = vsub.s32 32, %v839_v27  ;;  %v841_v5 = vshll.u32 %v2164_v57, %v839_v27  ;;  %v844_v8 = vsub.s32 4294967266, %v839_v27 }
  0xf8   :  { %v723_v12 = vsel %vm712_vm7, nan, %v722_v14  ;;  %v857_v43 = vsel %vm2190_vm13, 0, %v2219_v15  ;;  %v927_v7 = vsel %vm923_vm6, %v907_v20, %v2158_v28  ;;  %v946_v57 = vmul.u32 %v942_v52, %v941_v41 }
  0xf9   :  { %v724_v53 = vmul.f32 %v723_v12, %v1773_v18  ;;  %v842_v1 = vshrl.u32 %v2153_v6, %v840_v54  ;;  %v845_v37 = vadd.s32 127, %v844_v8  ;;  %v967_v33 = vmul.u32 %v965_v63, %v940_v38 }
  0xfa   :  { %v947_v13 = vmul.u32 %v943_v47, %v941_v41  ;;  %v948_v10 = vshll.u32 %v945_v51, 16  ;;  %v929_v6 = vsel %vm925_vm9, %v2161_v3, %v928_v21  ;;  %v950_v56 = vshll.u32 %v946_v57, 16 }
  0xfb   :  { %726 = vst [vmem:[#allocation7 + $0x18] sm:$0xff] %v724_v53  ;;  %v843_v45 = vor.u32 %v842_v1, %v841_v5  ;;  %v846_v19 = vshll.u32 %v845_v37, 23  ;;  %v966_v35 = vmul.u32 %v964_v39, %v940_v38  ;;  %v968_v32 = vmul.u32 %v964_v39, %v941_v41 }
  0xfc   :  { %vm952_vm15 = vc.u32 %v944_v26, %v948_v10  ;;  %v954_v55 = vadd.s32 %v948_v10, %v944_v26  ;;  %v969_v49 = vmul.u32 %v965_v63, %v941_v41  ;;  %v970_v4 = vshll.u32 %v967_v33, 16 }
  0xfd   :  { %v847_v29 = vor.u32 4788187, %v846_v19  ;;  %v850_v16 = vcvt.s32.f32 %v843_v45  ;;  %v953_v28 = vsel %vm952_vm15, 1, %v1527_v22  ;;  %v972_v50 = vshll.u32 %v968_v32, 16 }
  0xfe   :  { %v949_v30 = vshrl.u32 %v945_v51, 16  ;;  %v955_v46 = vadd.s32 %v953_v28, %v947_v13  ;;  %vm956_vm0 = vc.u32 %v954_v55, %v950_v56  ;;  %v951_v24 = vshrl.u32 %v946_v57, 16 }
  0xff   :  { %v848_v34 = vand.u32 2147483647, %v847_v29  ;;  %v957_v52 = vsel %vm956_vm0, 1, %v1527_v22  ;;  %vm974_vm1 = vc.u32 %v966_v35, %v970_v4  ;;  %v976_v3 = vadd.s32 %v970_v4, %v966_v35 }
 0x100   :  { %v959_v20 = vadd.s32 %v957_v52, %v955_v46  ;;  %v975_v47 = vsel %vm974_vm1, 1, %v1527_v22  ;;  %vm1063_vm2 = vcmp.gt.s32.totalorder %v1062_v25, 0  ;;  %v971_v31 = vshrl.u32 %v967_v33, 16 }
 0x101   :  { %v851_v38 = vmul.f32 %v850_v16, %v848_v34  ;;  %v977_v27 = vadd.s32 %v975_v47, %v969_v49  ;;  %vm978_vm3 = vc.u32 %v976_v3, %v972_v50  ;;  %v1064_v41 = vsel %vm1063_vm2, %v1062_v25, 0 }
 0x102   :  { %v930_v63 = vsel %vm924_vm12, %v927_v7, %v929_v6  ;;  %v960_v14 = vadd.s32 %v959_v20, %v949_v30  ;;  %v979_v54 = vsel %vm978_vm3, 1, %v1527_v22  ;;  %v973_v5 = vshrl.u32 %v968_v32, 16 }
 0x103   :  { %v852_v15 = vxor.u32 2147483648, %v851_v38  ;;  %v2245_v8 = vadd.s32 %v976_v3, %v972_v50  ;;  %v981_v12 = vadd.s32 %v979_v54, %v977_v27  ;;  %v1066_v21 = vand.u32 31, %v1064_v41 }
 0x104   :  { %v2249_v39 = vadd.s32 %v960_v14, %v951_v24  ;;  %v1060_v40 = vor.u32 8388608, %v2202_v42  ;;  %v874_v51 = vadd.s32 3, %v857_v43  ;;  %v984_v7 = vmul.u32 %v2171_v48, %v930_v63 }
 0x105   :  { %v853_v26 = vsel %vm732_vm8, %v852_v15, %v851_v38  ;;  %v982_v53 = vadd.s32 %v981_v12, %v971_v31  ;;  %v2255_v1 = vsub.s32 32, %v1066_v21  ;;  %v2258_v57 = vshrl.u32 %v1064_v41, 5 }
 0x106   :  { %v856_v25 = vsel %vm2190_vm13, %v1884_v36, %v853_v26  ;;  %vm986_vm4 = vc.u32 %v2249_v39, %v2245_v8  ;;  %v1069_v45 = vshll.u32 %v1521_v58, %v1066_v21  ;;  %v1072_v42 = vshll.u32 %v1522_v60, %v1066_v21 }
 0x107   :  { %v858_v37 = vmul.f32 %v856_v25, %v856_v25  ;;  %v983_v33 = vadd.s32 %v982_v53, %v973_v5  ;;  %v1070_v9 = vshrl.u32 %v1522_v60, %v2255_v1  ;;  %v1073_v43 = vshrl.u32 %v1523_v62, %v2255_v1 }
 0x108   :  { %v1075_v48 = vshll.u32 %v1523_v62, %v1066_v21  ;;  %v1076_v6 = vshrl.u32 %v1524_v0, %v2255_v1  ;;  %v1078_v56 = vshll.u32 %v1524_v0, %v1066_v21  ;;  %v1079_v29 = vshrl.u32 %v1525_v2, %v2255_v1 }
 0x109   :  { %v859_v19 = vmul.f32 -0.001358992, %v858_v37  ;;  %v866_v13 = vmul.f32 -0.00019511016, %v858_v37  ;;  %v987_v10 = vadd.s32 1, %v983_v33  ;;  %vm1084_vm5 = vcmp.lt.s32.totalorder %v2258_v57, 1 }
 0x10a   :  { %v2275_v55 = vor.u32 %v1070_v9, %v1069_v45  ;;  %v1081_v28 = vshll.u32 %v1525_v2, %v1066_v21  ;;  %v1082_v49 = vshrl.u32 %v1526_v11, %v2255_v1  ;;  %v2280_v30 = vor.u32 %v1073_v43, %v1072_v42 }
 0x10b   :  { %v860_v35 = vadd.f32 0.041655596, %v859_v19  ;;  %v867_v32 = vadd.f32 0.008332121, %v866_v13  ;;  %v988_v16 = vsel %vm986_vm4, %v987_v10, %v983_v33  ;;  %v1077_v46 = vor.u32 %v1076_v6, %v1075_v48 }
 0x10c   :  { %v989_v34 = vadd.s32 %v988_v16, %v984_v7  ;;  %v1080_v24 = vor.u32 %v1079_v29, %v1078_v56  ;;  %v1083_v52 = vor.u32 %v1082_v49, %v1081_v28  ;;  %vm1087_vm6 = vcmp.lt.s32.totalorder %v2258_v57, 4  ;;  %v1436_v7 = vld [vmem:[#allocation2 + $0x7] ss:$0 sm:$0xff] }
 0x10d   :  { %v861_v4 = vmul.f32 %v860_v35, %v858_v37  ;;  %v868_v50 = vmul.f32 %v867_v32, %v858_v37  ;;  %vm1086_vm7 = vcmp.lt.s32.totalorder %v2258_v57, 3  ;;  %v875_v47 = vand.u32 3, %v874_v51 }
 0x10e   :  { %v990_v20 = vadd.s32 536870912, %v989_v34  ;;  %vm1085_vm8 = vcmp.lt.s32.totalorder %v2258_v57, 2  ;;  %v1093_v31 = vsel %vm1087_vm6, %v1080_v24, 920167782  ;;  %v1092_v63 = vsel %vm1084_vm5, %v2275_v55, %v2280_v30 }
 0x10f   :  { %v862_v3 = vadd.f32 -0.4999988, %v861_v4  ;;  %v869_v38 = vadd.f32 -0.16666654, %v868_v50  ;;  %v1094_v14 = vsel %vm1086_vm7, %v1077_v46, %v1093_v31  ;;  %v1097_v54 = vsel %vm1087_vm6, %v1083_v52, 1326507024 }
 0x110   :  { %v2287_v15 = vshrl.u32 %v990_v20, 30  ;;  %v2297_v5 = vshll.u32 %v1060_v40, 8  ;;  %v1096_v53 = vsel %vm1084_vm5, %v2280_v30, %v1077_v46  ;;  %vm876_vm9 = vcmp.lt.s32.totalorder %v875_v47, 2 }
 0x111   :  { %v863_v27 = vmul.f32 %v862_v3, %v858_v37  ;;  %v870_v41 = vmul.f32 %v869_v38, %v858_v37  ;;  %vm880_vm10 = vcmp.eq.s32.totalorder %v875_v47, 2  ;;  %v1095_v37 = vsel %vm1085_vm8, %v1092_v63, %v1094_v14 }
 0x112   :  { %v992_v26 = vshll.u32 %v2287_v15, 30  ;;  %v1098_v51 = vsel %vm1086_vm7, %v1080_v24, %v1097_v54  ;;  %vm877_vm11 = vcmp.eq.s32.totalorder %v875_v47, 0  ;;  %v1101_v19 = vand.u32 65535, %v2297_v5 }
 0x113   :  { %v864_v12 = vadd.f32 1.0, %v863_v27  ;;  %v871_v21 = vadd.f32 1.0, %v870_v41  ;;  %v1099_v9 = vsel %vm1085_vm8, %v1096_v53, %v1098_v51  ;;  %v1102_v13 = vshrl.u32 %v2297_v5, 16 }
 0x114   :  { %v993_v45 = vsub.s32 %v989_v34, %v992_v26  ;;  %v1126_v42 = vshrl.u32 %v1095_v37, 16  ;;  %vm873_vm13 = vweird.f32 %v1884_v36  ;;  %v1103_v6 = vand.u32 65535, %v1099_v9 }
 0x115   :  { %v872_v33 = vmul.f32 %v871_v21, %v856_v25  ;;  %v881_v40 = vxor.u32 2147483648, %v864_v12  ;;  %v1104_v56 = vshrl.u32 %v1099_v9, 16  ;;  %v2313_v25 = vmul.f32 %v1436_v7, %v1557_v23 }
 0x116   :  { %vm994_vm12 = vcmp.lt.s32.totalorder %v993_v45, 0  ;;  %v995_v48 = vsub.s32 0, %v993_v45  ;;  %v1068_v29 = vshrl.u32 %v1521_v58, %v2255_v1  ;;  %v1125_v16 = vand.u32 65535, %v1095_v37 }
 0x117   :  { %v878_v43 = vxor.u32 2147483648, %v872_v33  ;;  %v882_v10 = vsel %vm880_vm10, %v881_v40, %v872_v33  ;;  %v1105_v4 = vmul.u32 %v1103_v6, %v1101_v19  ;;  %v1106_v50 = vmul.u32 %v1104_v56, %v1101_v19 }
 0x118   :  { %v996_v32 = vsel %vm994_vm12, %v995_v48, %v993_v45  ;;  %v1089_v36 = vsel %vm1087_vm6, %v1077_v46, 2102212464  ;;  %v1107_v24 = vmul.u32 %v1103_v6, %v1102_v13  ;;  %v1128_v52 = vmul.u32 %v1126_v42, %v1101_v19 }
 0x119   :  { %v879_v35 = vsel %vm877_vm11, %v864_v12, %v878_v43  ;;  %v997_v49 = vclz %v996_v32  ;;  %v1108_v38 = vmul.u32 %v1104_v56, %v1102_v13  ;;  %v1109_v20 = vshll.u32 %v1106_v50, 16 }
 0x11a   :  { %v883_v28 = vsel %vm876_vm9, %v879_v35, %v882_v10  ;;  %v985_v1 = vadd.s32 %v2245_v8, %v2249_v39  ;;  %v1088_v47 = vsel %vm1084_vm5, %v1068_v29, %v2275_v55  ;;  %v1111_v31 = vshll.u32 %v1107_v24, 16 }
 0x11b   :  { %v884_v34 = vsel %vm873_vm13, nan, %v883_v28  ;;  %v1408_v3 = vadd.s32 4294967294, %v997_v49  ;;  %v1129_v27 = vmul.u32 %v1125_v16, %v1102_v13  ;;  %v1090_v46 = vsel %vm1086_vm7, %v2280_v30, %v1089_v36 }
 0x11c   :  { %v885_v23 = vmul.f32 %v884_v34, %v1773_v18  ;;  %vm1113_vm15 = vc.u32 %v1105_v4, %v1109_v20  ;;  %v1115_v41 = vadd.s32 %v1109_v20, %v1105_v4  ;;  %v1127_v54 = vmul.u32 %v1125_v16, %v1101_v19 }
 0x11d   :  { %vm1409_vm14 = vcmp.lt.s32.totalorder %v1408_v3, 0  ;;  %v1114_v14 = vsel %vm1113_vm15, 1, %v1527_v22  ;;  %v1131_v12 = vshll.u32 %v1128_v52, 16  ;;  %v1110_v55 = vshrl.u32 %v1106_v50, 16 }
 0x11e   :  { %887 = vst [vmem:[#allocation7 + $0x20] sm:$0xff] %v885_v23  ;;  %v1000_v63 = vsel %vm1409_vm14, 0, %v1408_v3  ;;  %v1116_v26 = vadd.s32 %v1114_v14, %v1108_v38  ;;  %vm1117_vm0 = vc.u32 %v1115_v41, %v1111_v31  ;;  %v1130_v53 = vmul.u32 %v1126_v42, %v1102_v13 }
 0x11f   :  { %v1001_v8 = vsub.s32 32, %v1000_v63  ;;  %v1002_v39 = vshll.u32 %v993_v45, %v1000_v63  ;;  %v1005_v21 = vsub.s32 4294967266, %v1000_v63  ;;  %v1133_v37 = vshll.u32 %v1129_v27, 16 }
 0x120   :  { %v1015_v33 = vsub.s32 4, %v2287_v15  ;;  %v1118_v30 = vsel %vm1117_vm0, 1, %v1527_v22  ;;  %v1112_v40 = vshrl.u32 %v1107_v24, 16  ;;  %vm1135_vm1 = vc.u32 %v1127_v54, %v1131_v12 }
 0x121   :  { %v1003_v51 = vshrl.u32 %v985_v1, %v1001_v8  ;;  %v1006_v7 = vadd.s32 127, %v1005_v21  ;;  %v1120_v9 = vadd.s32 %v1118_v30, %v1116_v26  ;;  %v1137_v43 = vadd.s32 %v1131_v12, %v1127_v54 }
 0x122   :  { %v1136_v45 = vsel %vm1135_vm1, 1, %v1527_v22  ;;  %v1216_v48 = vand.u32 2139095040, %v2313_v25  ;;  %v1132_v56 = vshrl.u32 %v1128_v52, 16  ;;  %vm893_vm3 = vcmp.lt.s32.totalorder %v2092_v59, 0 }
 0x123   :  { %v1004_v19 = vor.u32 %v1003_v51, %v1002_v39  ;;  %v1007_v10 = vshll.u32 %v1006_v7, 23  ;;  %v1121_v6 = vadd.s32 %v1120_v9, %v1110_v55  ;;  %v1138_v13 = vadd.s32 %v1136_v45, %v1130_v53 }
 0x124   :  { %vm1139_vm2 = vc.u32 %v1137_v43, %v1133_v37  ;;  %v1217_v29 = vshrl.u32 %v1216_v48, 23  ;;  %v1091_v16 = vsel %vm1085_vm8, %v1088_v47, %v1090_v46  ;;  %v1134_v28 = vshrl.u32 %v1129_v27, 16 }
 0x125   :  { %v1008_v42 = vor.u32 4788187, %v1007_v10  ;;  %v1011_v35 = vcvt.s32.f32 %v1004_v19  ;;  %v1140_v32 = vsel %vm1139_vm2, 1, %v1527_v22  ;;  %v2338_v50 = vadd.s32 %v1121_v6, %v1112_v40 }
 0x126   :  { %v1142_v49 = vadd.s32 %v1140_v32, %v1138_v13  ;;  %v2340_v34 = vadd.s32 %v1137_v43, %v1133_v37  ;;  %v1413_v36 = vadd.s32 4294967169, %v1217_v29  ;;  %v1016_v24 = vsel %vm893_vm3, %v1015_v33, %v2287_v15 }
 0x127   :  { %v1009_v4 = vand.u32 2147483647, %v1008_v42  ;;  %vm892_vm4 = vcmp.le.f32.partialorder %v891_v17, 0.7853982  ;;  %v1145_v38 = vmul.u32 %v2297_v5, %v1091_v16  ;;  %v1213_v17 = vand.u32 2147483647, %v2313_v25 }
 0x128   :  { %v1143_v52 = vadd.s32 %v1142_v49, %v1132_v56  ;;  %v1223_v3 = vadd.s32 1, %v1413_v36  ;;  %v1018_v1 = vsel %vm892_vm4, 0, %v1016_v24  ;;  %vm1147_vm5 = vc.u32 %v2338_v50, %v2340_v34 }
 0x129   :  { %v1012_v23 = vmul.f32 %v1011_v35, %v1009_v4  ;;  %v1035_v41 = vadd.s32 3, %v1018_v1  ;;  %vm1034_vm13 = vweird.f32 %v2092_v59  ;;  %vm1054_vm1 = vcmp.lt.s32.totalorder %v2127_v61, 0 }
 0x12a   :  { %v1144_v57 = vadd.s32 %v1143_v52, %v1134_v28  ;;  %vm1224_vm6 = vcmp.gt.s32.totalorder %v1223_v3, 0  ;;  %vm2425_vm2 = vcmp.le.f32.partialorder %v1052_v44, 0.7853982 }
 0x12b   :  { %v1013_v20 = vxor.u32 2147483648, %v1012_v23  ;;  %v1225_v31 = vsel %vm1224_vm6, %v1223_v3, 0  ;;  %v1036_v45 = vand.u32 3, %v1035_v41 }
 0x12c   :  { %v1148_v47 = vadd.s32 1, %v1144_v57  ;;  %v1227_v27 = vand.u32 31, %v1225_v31  ;;  %v2354_v54 = vshrl.u32 %v1225_v31, 5 }
 0x12d   :  { %v1014_v15 = vsel %vm893_vm3, %v1013_v20, %v1012_v23  ;;  %vm1041_vm8 = vcmp.eq.s32.totalorder %v1036_v45, 2  ;;  %vm1038_vm14 = vcmp.eq.s32.totalorder %v1036_v45, 0  ;;  %vm1037_vm15 = vcmp.lt.s32.totalorder %v1036_v45, 2 }
 0x12e   :  { %v1017_v46 = vsel %vm892_vm4, %v2092_v59, %v1014_v15  ;;  %v1149_v63 = vsel %vm1147_vm5, %v1148_v47, %v1144_v57  ;;  %v2356_v12 = vsub.s32 32, %v1227_v27  ;;  %v1230_v8 = vshll.u32 %v1521_v58, %v1227_v27 }
 0x12f   :  { %v1019_v14 = vmul.f32 %v1017_v46, %v1017_v46  ;;  %v1150_v5 = vadd.s32 %v1149_v63, %v1145_v38  ;;  %v1233_v39 = vshll.u32 %v1522_v60, %v1227_v27  ;;  %v1236_v21 = vshll.u32 %v1523_v62, %v1227_v27 }
 0x130   :  { %v1239_v26 = vshll.u32 %v1524_v0, %v1227_v27  ;;  %v1242_v51 = vshll.u32 %v1525_v2, %v1227_v27  ;;  %v1231_v7 = vshrl.u32 %v1522_v60, %v2356_v12  ;;  %v1234_v33 = vshrl.u32 %v1523_v62, %v2356_v12 }
 0x131   :  { %v1020_v55 = vmul.f32 -0.001358992, %v1019_v14  ;;  %v1027_v53 = vmul.f32 -0.00019511016, %v1019_v14  ;;  %v1151_v37 = vadd.s32 536870912, %v1150_v5  ;;  %v1237_v30 = vshrl.u32 %v1524_v0, %v2356_v12 }
 0x132   :  { %v1240_v40 = vshrl.u32 %v1525_v2, %v2356_v12  ;;  %v1243_v10 = vshrl.u32 %v1526_v11, %v2356_v12  ;;  %v1220_v60 = vand.u32 8388607, %v1213_v17  ;;  %v2378_v56 = vor.u32 %v1231_v7, %v1230_v8 }
 0x133   :  { %v1021_v9 = vadd.f32 0.041655596, %v1020_v55  ;;  %v1028_v43 = vadd.f32 0.008332121, %v1027_v53  ;;  %v2371_v19 = vshrl.u32 %v1151_v37, 30  ;;  %v2380_v0 = vor.u32 %v1234_v33, %v1233_v39 }
 0x134   :  { %v2382_v2 = vor.u32 %v1237_v30, %v1236_v21  ;;  %v1241_v13 = vor.u32 %v1240_v40, %v1239_v26  ;;  %v1244_v42 = vor.u32 %v1243_v10, %v1242_v51  ;;  %vm1245_vm7 = vcmp.lt.s32.totalorder %v2354_v54, 1 }
 0x135   :  { %v1022_v48 = vmul.f32 %v1021_v9, %v1019_v14  ;;  %v1029_v6 = vmul.f32 %v1028_v43, %v1019_v14  ;;  %v1153_v62 = vshll.u32 %v2371_v19, 30  ;;  %v1221_v11 = vor.u32 8388608, %v1220_v60 }
 0x136   :  { %vm1247_vm9 = vcmp.lt.s32.totalorder %v2354_v54, 3  ;;  %vm1248_vm10 = vcmp.lt.s32.totalorder %v2354_v54, 4  ;;  %vm1246_vm12 = vcmp.lt.s32.totalorder %v2354_v54, 2  ;;  %v1253_v4 = vsel %vm1245_vm7, %v2378_v56, %v2380_v0 }
 0x137   :  { %v1023_v35 = vadd.f32 -0.4999988, %v1022_v48  ;;  %v1030_v32 = vadd.f32 -0.16666654, %v1029_v6  ;;  %v1154_v29 = vsub.s32 %v1150_v5, %v1153_v62  ;;  %v1254_v36 = vsel %vm1248_vm10, %v1241_v13, 920167782 }
 0x138   :  { %v1258_v24 = vsel %vm1248_vm10, %v1244_v42, 1326507024  ;;  %v1257_v57 = vsel %vm1245_vm7, %v2380_v0, %v2382_v2  ;;  %v1255_v20 = vsel %vm1247_vm9, %v2382_v2, %v1254_v36  ;;  %v2405_v47 = vshll.u32 %v1221_v11, 8 }
 0x139   :  { %v1024_v16 = vmul.f32 %v1023_v35, %v1019_v14  ;;  %v1031_v28 = vmul.f32 %v1030_v32, %v1019_v14  ;;  %vm1155_vm11 = vcmp.lt.s32.totalorder %v1154_v29, 0  ;;  %v1156_v49 = vsub.s32 0, %v1154_v29 }
 0x13a   :  { %v1259_v1 = vsel %vm1247_vm9, %v1241_v13, %v1258_v24  ;;  %v1256_v41 = vsel %vm1246_vm12, %v1253_v4, %v1255_v20  ;;  %v1146_v39 = vadd.s32 %v2340_v34, %v2338_v50  ;;  %v1263_v53 = vshrl.u32 %v2405_v47, 16 }
 0x13b   :  { %v1025_v52 = vadd.f32 1.0, %v1024_v16  ;;  %v1032_v23 = vadd.f32 1.0, %v1031_v28  ;;  %v1157_v3 = vsel %vm1155_vm11, %v1156_v49, %v1154_v29  ;;  %v1260_v63 = vsel %vm1246_vm12, %v1257_v57, %v1259_v1 }
 0x13c   :  { %v1158_v38 = vclz %v1157_v3  ;;  %v1264_v8 = vand.u32 65535, %v1260_v63  ;;  %v1265_v21 = vshrl.u32 %v1260_v63, 16  ;;  %v1287_v37 = vshrl.u32 %v1256_v41, 16 }
 0x13d   :  { %v1033_v31 = vmul.f32 %v1032_v23, %v1017_v46  ;;  %v1042_v15 = vxor.u32 2147483648, %v1025_v52  ;;  %v1262_v46 = vand.u32 65535, %v2405_v47  ;;  %v1286_v43 = vand.u32 65535, %v1256_v41 }
 0x13e   :  { %v1411_v27 = vadd.s32 4294967294, %v1158_v38  ;;  %v1229_v60 = vshrl.u32 %v1521_v58, %v2356_v12  ;;  %v1268_v48 = vmul.u32 %v1264_v8, %v1263_v53  ;;  %v1269_v42 = vmul.u32 %v1265_v21, %v1263_v53 }
 0x13f   :  { %v1039_v14 = vxor.u32 2147483648, %v1033_v31  ;;  %v1043_v5 = vsel %vm1041_vm8, %v1042_v15, %v1033_v31  ;;  %v1266_v9 = vmul.u32 %v1264_v8, %v1262_v46  ;;  %v1267_v45 = vmul.u32 %v1265_v21, %v1262_v46 }
 0x140   :  { %vm1412_vm0 = vcmp.lt.s32.totalorder %v1411_v27, 0  ;;  %v1289_v6 = vmul.u32 %v1287_v37, %v1262_v46  ;;  %v1176_v32 = vsub.s32 4, %v2371_v19  ;;  %v1288_v11 = vmul.u32 %v1286_v43, %v1262_v46 }
 0x141   :  { %v1040_v26 = vsel %vm1038_vm14, %v1025_v52, %v1039_v14  ;;  %v1161_v55 = vsel %vm1412_vm0, 0, %v1411_v27  ;;  %v1270_v35 = vshll.u32 %v1267_v45, 16  ;;  %v1290_v16 = vmul.u32 %v1286_v43, %v1263_v53 }
 0x142   :  { %v1044_v51 = vsel %vm1037_vm15, %v1040_v26, %v1043_v5  ;;  %v1162_v7 = vsub.s32 32, %v1161_v55  ;;  %v1163_v33 = vshll.u32 %v1154_v29, %v1161_v55  ;;  %v1166_v30 = vsub.s32 4294967266, %v1161_v55 }
 0x143   :  { %v1045_v40 = vsel %vm1034_vm13, nan, %v1044_v51  ;;  %v1272_v29 = vshll.u32 %v1268_v48, 16  ;;  %vm1274_vm3 = vc.u32 %v1266_v9, %v1270_v35  ;;  %v1276_v12 = vadd.s32 %v1270_v35, %v1266_v9 }
 0x144   :  { %v1046_v50 = vmul.f32 %v1045_v40, %v1773_v18  ;;  %v1164_v34 = vshrl.u32 %v1146_v39, %v1162_v7  ;;  %v1167_v10 = vadd.s32 127, %v1166_v30  ;;  %v1275_v49 = vsel %vm1274_vm3, 1, %v1527_v22 }
 0x145   :  { %v1291_v4 = vmul.u32 %v1287_v37, %v1263_v53  ;;  %v1292_v44 = vshll.u32 %v1289_v6, 16  ;;  %v1294_v36 = vshll.u32 %v1290_v16, 16  ;;  %v1271_v52 = vshrl.u32 %v1267_v45, 16 }
 0x146   :  { %1048 = vst [vmem:[#allocation7 + $0x28] sm:$0xff] %v1046_v50  ;;  %v1165_v62 = vor.u32 %v1164_v34, %v1163_v33  ;;  %v1168_v13 = vshll.u32 %v1167_v10, 23  ;;  %v1277_v23 = vadd.s32 %v1275_v49, %v1269_v42  ;;  %vm1278_vm4 = vc.u32 %v1276_v12, %v1272_v29 }
 0x147   :  { %v1250_v3 = vsel %vm1248_vm10, %v2382_v2, 2102212464  ;;  %v1279_v57 = vsel %vm1278_vm4, 1, %v1527_v22  ;;  %vm1296_vm5 = vc.u32 %v1288_v11, %v1292_v44  ;;  %v1298_v38 = vadd.s32 %v1292_v44, %v1288_v11 }
 0x148   :  { %v1169_v28 = vor.u32 4788187, %v1168_v13  ;;  %v1172_v58 = vcvt.s32.f32 %v1165_v62  ;;  %v1273_v1 = vshrl.u32 %v1268_v48, 16  ;;  %v1281_v31 = vadd.s32 %v1279_v57, %v1277_v23 }
 0x149   :  { %v1297_v15 = vsel %vm1296_vm5, 1, %v1527_v22  ;;  %v1249_v27 = vsel %vm1245_vm7, %v1229_v60, %v2378_v56  ;;  %v1293_v41 = vshrl.u32 %v1289_v6, 16  ;;  %vm1300_vm6 = vc.u32 %v1298_v38, %v1294_v36 }
 0x14a   :  { %v1170_v24 = vand.u32 2147483647, %v1169_v28  ;;  %v1299_v63 = vadd.s32 %v1297_v15, %v1291_v4  ;;  %v1251_v2 = vsel %vm1247_vm9, %v2380_v0, %v1250_v3  ;;  %v1282_v5 = vadd.s32 %v1281_v31, %v1271_v52 }
 0x14b   :  { %v1301_v8 = vsel %vm1300_vm6, 1, %v1527_v22  ;;  %v1295_v39 = vshrl.u32 %v1290_v16, 16  ;;  %v1177_v56 = vsel %vm1054_vm1, %v1176_v32, %v2371_v19  ;;  %v1302_v55 = vadd.s32 %v1298_v38, %v1294_v36 }
 0x14c   :  { %v1173_v20 = vmul.f32 %v1172_v58, %v1170_v24  ;;  %v1303_v46 = vadd.s32 %v1301_v8, %v1299_v63  ;;  %v1283_v26 = vadd.s32 %v1282_v5, %v1273_v1  ;;  %v1252_v0 = vsel %vm1246_vm12, %v1249_v27, %v1251_v2 }
 0x14d   :  { %v1179_v51 = vsel %vm2425_vm2, 0, %v1177_v56  ;;  %v1306_v40 = vmul.u32 %v2405_v47, %v1252_v0  ;;  %vm1195_vm12 = vweird.f32 %v2127_v61  ;;  %vm1215_vm14 = vcmp.lt.s32.totalorder %v2313_v25, 0 }
 0x14e   :  { %v1174_v14 = vxor.u32 2147483648, %v1173_v20  ;;  %v1304_v37 = vadd.s32 %v1303_v46, %v1293_v41  ;;  %vm1308_vm7 = vc.u32 %v1283_v26, %v1302_v55  ;;  %v1196_v50 = vadd.s32 3, %v1179_v51 }
 0x14f   :  { %v1307_v3 = vadd.s32 %v1302_v55, %v1283_v26  ;;  %vm1214_vm15 = vcmp.le.f32.partialorder %v1213_v17, 0.7853982  ;;  %vm1356_vm3 = vweird.f32 %v2313_v25 }
 0x150   :  { %v1175_v21 = vsel %vm1054_vm1, %v1174_v14, %v1173_v20  ;;  %v1305_v7 = vadd.s32 %v1304_v37, %v1295_v39  ;;  %v1197_v62 = vand.u32 3, %v1196_v50 }
 0x151   :  { %v1178_v53 = vsel %vm2425_vm2, %v2127_v61, %v1175_v21 }
 0x152   :  { %v1180_v22 = vmul.f32 %v1178_v53, %v1178_v53  ;;  %v1309_v19 = vadd.s32 1, %v1305_v7  ;;  %vm1202_vm8 = vcmp.eq.s32.totalorder %v1197_v62, 2  ;;  %vm1198_vm9 = vcmp.lt.s32.totalorder %v1197_v62, 2 }
 0x153   :  { %vm1199_vm10 = vcmp.eq.s32.totalorder %v1197_v62, 0 }
 0x154   :  { %v1181_v33 = vmul.f32 -0.001358992, %v1180_v22  ;;  %v1188_v30 = vmul.f32 -0.00019511016, %v1180_v22  ;;  %v1310_v34 = vsel %vm1308_vm7, %v1309_v19, %v1305_v7 }
 0x155   :  { %v1311_v54 = vadd.s32 %v1310_v34, %v1306_v40 }
 0x156   :  { %v1182_v9 = vadd.f32 0.041655596, %v1181_v33  ;;  %v1189_v43 = vadd.f32 0.008332121, %v1188_v30 }
 0x157   :  { %v1312_v6 = vadd.s32 536870912, %v1311_v54 }
 0x158   :  { %v1183_v10 = vmul.f32 %v1182_v9, %v1180_v22  ;;  %v1190_v45 = vmul.f32 %v1189_v43, %v1180_v22 }
 0x159   :  { %v1313_v42 = vshrl.u32 %v1312_v6, 30 }
 0x15a   :  { %v1184_v60 = vadd.f32 -0.4999988, %v1183_v10  ;;  %v1191_v48 = vadd.f32 -0.16666654, %v1190_v45 }
 0x15b   :  { %v1314_v29 = vshll.u32 %v1313_v42, 30  ;;  %v1337_v5 = vsub.s32 4, %v1313_v42 }
 0x15c   :  { %v1185_v59 = vmul.f32 %v1184_v60, %v1180_v22  ;;  %v1192_v13 = vmul.f32 %v1191_v48, %v1180_v22 }
 0x15d   :  { %v1315_v16 = vsub.s32 %v1311_v54, %v1314_v29  ;;  %v1338_v46 = vsel %vm1215_vm14, %v1337_v5, %v1313_v42 }
 0x15e   :  { %v1186_v35 = vadd.f32 1.0, %v1185_v59  ;;  %v1193_v32 = vadd.f32 1.0, %v1192_v13  ;;  %v1340_v26 = vsel %vm1214_vm15, 0, %v1338_v46 }
 0x15f   :  { %vm1316_vm11 = vcmp.lt.s32.totalorder %v1315_v16, 0  ;;  %v1317_v12 = vsub.s32 0, %v1315_v16  ;;  %v1357_v22 = vadd.s32 3, %v1340_v26 }
 0x160   :  { %v1194_v47 = vmul.f32 %v1193_v32, %v1178_v53  ;;  %v1203_v11 = vxor.u32 2147483648, %v1186_v35 }
 0x161   :  { %v1318_v4 = vsel %vm1316_vm11, %v1317_v12, %v1315_v16  ;;  %v1358_v40 = vand.u32 3, %v1357_v22 }
 0x162   :  { %v1200_v28 = vxor.u32 2147483648, %v1194_v47  ;;  %v1204_v58 = vsel %vm1202_vm8, %v1203_v11, %v1194_v47  ;;  %v1319_v36 = vclz %v1318_v4 }
 0x163   :  { %vm1363_vm0 = vcmp.eq.s32.totalorder %v1358_v40, 2  ;;  %vm1360_vm1 = vcmp.eq.s32.totalorder %v1358_v40, 0  ;;  %vm1359_vm2 = vcmp.lt.s32.totalorder %v1358_v40, 2 }
 0x164   :  { %v1201_v49 = vsel %vm1199_vm10, %v1186_v35, %v1200_v28  ;;  %v1414_v23 = vadd.s32 4294967294, %v1319_v36 }
 0x165   :  { %v1205_v44 = vsel %vm1198_vm9, %v1201_v49, %v1204_v58 }
 0x166   :  { %v1206_v24 = vsel %vm1195_vm12, nan, %v1205_v44  ;;  %vm1415_vm13 = vcmp.lt.s32.totalorder %v1414_v23, 0 }
 0x167   :  { %v1207_v52 = vmul.f32 %v1206_v24, %v1773_v18  ;;  %v1322_v57 = vsel %vm1415_vm13, 0, %v1414_v23 }
 0x168   :  { %v1323_v38 = vsub.s32 32, %v1322_v57  ;;  %v1324_v20 = vshll.u32 %v1315_v16, %v1322_v57  ;;  %v1327_v1 = vsub.s32 4294967266, %v1322_v57 }
 0x169   :  { %1209 = vst [vmem:[#allocation7 + $0x30] sm:$0xff] %v1207_v52 }
 0x16a   :  { %v1325_v31 = vshrl.u32 %v1307_v3, %v1323_v38  ;;  %v1328_v15 = vadd.s32 127, %v1327_v1 }
 0x16c   :  { %v1326_v27 = vor.u32 %v1325_v31, %v1324_v20  ;;  %v1329_v41 = vshll.u32 %v1328_v15, 23 }
 0x16e   :  { %v1330_v61 = vor.u32 4788187, %v1329_v41  ;;  %v1333_v63 = vcvt.s32.f32 %v1326_v27 }
 0x170   :  { %v1331_v14 = vand.u32 2147483647, %v1330_v61 }
 0x172   :  { %v1334_v2 = vmul.f32 %v1333_v63, %v1331_v14 }
 0x174   :  { %v1335_v8 = vxor.u32 2147483648, %v1334_v2 }
 0x176   :  { %v1336_v39 = vsel %vm1215_vm14, %v1335_v8, %v1334_v2 }
 0x177   :  { %v1339_v21 = vsel %vm1214_vm15, %v2313_v25, %v1336_v39 }
 0x178   :  { %v1341_v56 = vmul.f32 %v1339_v21, %v1339_v21 }
 0x17a   :  { %v1342_v55 = vmul.f32 -0.001358992, %v1341_v56  ;;  %v1349_v53 = vmul.f32 -0.00019511016, %v1341_v56 }
 0x17c   :  { %v1343_v0 = vadd.f32 0.041655596, %v1342_v55  ;;  %v1350_v37 = vadd.f32 0.008332121, %v1349_v53 }
 0x17e   :  { %v1344_v51 = vmul.f32 %v1343_v0, %v1341_v56  ;;  %v1351_v7 = vmul.f32 %v1350_v37, %v1341_v56 }
 0x180   :  { %v1345_v33 = vadd.f32 -0.4999988, %v1344_v51  ;;  %v1352_v30 = vadd.f32 -0.16666654, %v1351_v7 }
 0x182   :  { %v1346_v19 = vmul.f32 %v1345_v33, %v1341_v56  ;;  %v1353_v9 = vmul.f32 %v1352_v30, %v1341_v56 }
 0x184   :  { %v1347_v17 = vadd.f32 1.0, %v1346_v19  ;;  %v1354_v43 = vadd.f32 1.0, %v1353_v9 }
 0x186   :  { %v1355_v50 = vmul.f32 %v1354_v43, %v1339_v21  ;;  %v1364_v34 = vxor.u32 2147483648, %v1347_v17 }
 0x188   :  { %v1361_v10 = vxor.u32 2147483648, %v1355_v50  ;;  %v1365_v45 = vsel %vm1363_vm0, %v1364_v34, %v1355_v50 }
 0x18a   :  { %v1362_v54 = vsel %vm1360_vm1, %v1347_v17, %v1361_v10 }
 0x18b   :  { %v1366_v60 = vsel %vm1359_vm2, %v1362_v54, %v1365_v45 }
 0x18c   :  { %v1367_v48 = vsel %vm1356_vm3, nan, %v1366_v60 }
 0x18d   :  { %v1368_v6 = vmul.f32 %v1367_v48, %v1773_v18 }
 0x18f   :  { %1370 = vst [vmem:[#allocation7 + $0x38] sm:$0xff] %v1368_v6 }
 0x190   :  { %1383 = dma.vmem_to_hbm [thread:$0]  %s1376_s1, 1024, %s1378_s23, [#allocation4], %s1519_s19, %s1519_s19, %s1520_s20  }
 0x191   :  { %1515 = dma.done.wait [#allocation4], 1024  }
 0x192   :  { %1516 = vsyncadd [#allocation4], 4294966272 }
 0x193   :  { %1388 = vsyncpa [#allocation3], 1 }
 0x194   :  { %1389 = vsyncpa [#allocation6], 1 }
 0x195   :  { %1390 = vsyncpa [#allocation4], 1 }

</bundles_post_ra>
